<compile_context>
chip_gen: v5e
topology: v5e:2x2
jax: 0.10.0
libtpu: 0.0.40
codegen_flags: <defaults>
</compile_context>

<pallas_src>
import functools

import jax
import jax.numpy as jnp
from jax.experimental import pallas as pl
from jax.experimental.pallas import tpu as pltpu


def block_kernel(x_ref, ln1g_ref, ln1b_ref, wqkv_ref, wp_ref, bp_ref,
                 ln2g_ref, ln2b_ref, w1_ref, b1_ref, w2_ref, b2_ref,
                 out_ref, att_ref, *, n_head, head_size, seq_len, eps):
    f32, bf16 = jnp.float32, jnp.bfloat16
    x = x_ref[...]                        # (R, D) f32, R = bt * T rows of (batch*seq)
    R, D = x.shape
    T = seq_len
    hs = head_size
    bt = R // T                           # batch elements handled this grid step

    def layer_norm(y, g_ref, b_ref):
        mu = jnp.mean(y, axis=-1, keepdims=True)
        var = jnp.mean(jnp.square(y - mu), axis=-1, keepdims=True)
        return (y - mu) * jax.lax.rsqrt(var + eps) * g_ref[...] + b_ref[...]

    # ---- ln1 + fused QKV projection: one (R,D)@(D,3D) bf16 MXU matmul ----
    xn = layer_norm(x, ln1g_ref, ln1b_ref)
    qkv = jnp.dot(xn.astype(bf16), wqkv_ref[...],
                  preferred_element_type=f32)                     # (R, 3D) f32

    # ---- causal multi-head attention ----
    # NOTE: reference scales by C**-0.5 with C = d_model (not head_size), keep it.
    scale = D ** (-0.5)
    row = jax.lax.broadcasted_iota(jnp.int32, (T, T), 0)
    col = jax.lax.broadcasted_iota(jnp.int32, (T, T), 1)
    causal = col <= row                   # hoisted once, reused for every (batch, head)

    # TODO(synk): for long T, replace the dense (T,T) score matrix with flash-style
    # KV tiling (online softmax + causal tile skipping).
    # TODO(synk): for large n_head, switch this static loop to a fori_loop/batched
    # einsum form to bound vreg live ranges.
    qk_dims = (((1,), (1,)), ((), ()))    # q @ k^T without materializing a transpose
    for b in range(bt):                   # static, bt is small
        rows = slice(b * T, (b + 1) * T)
        for h in range(n_head):           # static, n_head is small
            q = qkv[rows, h * hs:(h + 1) * hs].astype(bf16)               # (T, hs)
            k = qkv[rows, D + h * hs:D + (h + 1) * hs].astype(bf16)       # (T, hs)
            v = qkv[rows, 2 * D + h * hs:2 * D + (h + 1) * hs].astype(bf16)
            wei = jax.lax.dot_general(q, k, qk_dims,
                                      preferred_element_type=f32) * scale  # (T, T)
            wei = jnp.where(causal, wei, -jnp.inf)
            wei = wei - jnp.max(wei, axis=-1, keepdims=True)
            e = jnp.exp(wei)
            p = e * pl.reciprocal(jnp.sum(e, axis=-1, keepdims=True), approx=True)
            # write head output into its slot of the concat buffer (no per-head proj)
            att_ref[rows, h * hs:(h + 1) * hs] = jnp.dot(
                p.astype(bf16), v, preferred_element_type=f32)             # (T, hs)

    # ---- single full-D output projection over the concatenated heads ----
    sa = jnp.dot(att_ref[...].astype(bf16), wp_ref[...],
                 preferred_element_type=f32) + bp_ref[...]
    x1 = x + sa                            # first residual

    # ---- ln2 + feed-forward (full-width bf16 matmuls) ----
    xn2 = layer_norm(x1, ln2g_ref, ln2b_ref)
    h1 = jnp.maximum(jnp.dot(xn2.astype(bf16), w1_ref[...],
                             preferred_element_type=f32) + b1_ref[...], 0.0)
    ff = jnp.dot(h1.astype(bf16), w2_ref[...],
                 preferred_element_type=f32) + b2_ref[...]
    out_ref[...] = x1 + ff                 # second residual


def transformer_block(x, params, n_head, *, eps=1e-5):
    (ln1g, ln1b, wq, wk, wv, wp, bp, ln2g, ln2b, w1, b1, w2, b2) = params
    B, T, D = x.shape
    hs = D // n_head
    H4 = 4 * D

    # Fuse per-head Q/K/V weights into one (D, 3D) matrix.  Column layout matches the
    # kernel's slicing: columns [0,D)=Q, [D,2D)=K, [2D,3D)=V, head h at cols h*hs:(h+1)*hs.
    def fuse(w):                                          # (n_head, D, hs) -> (D, D)
        return jnp.transpose(w, (1, 0, 2)).reshape(D, n_head * hs)
    wqkv = jnp.concatenate([fuse(wq), fuse(wk), fuse(wv)], axis=1)

    # bf16 weights: halves weight DMA bytes / VMEM residency and hits the native bf16
    # MXU path; biases & LN params stay f32 (all element-wise math stays f32).
    bf16 = jnp.bfloat16
    wqkv_b, wp_b, w1_b, w2_b = (w.astype(bf16) for w in (wqkv, wp, w1, w2))

    # Several batch elements per grid step (rows = bt*T) to raise matmul M and amortize
    # per-step overhead, while keeping the row block a legal (multiple-of-8) tile.
    if T % 8 == 0:
        target = max(1, 128 // T)
        bt = 1
        for cand in range(min(B, target), 0, -1):
            if B % cand == 0:
                bt = cand
                break
    else:
        bt = B                       # single step; block spans the full row axis
    R = bt * T

    x2 = x.reshape(B * T, D)         # flatten (B,T) -> rows outside the kernel (free)

    def const_spec(shape):           # full-array weight block, constant index map
        return pl.BlockSpec(shape, lambda i: (0,) * len(shape))
    # TODO(synk): at realistic D, mark the weight specs single-buffered
    # (pipeline_mode=pl.Buffered(1)) so resident bf16 weights fit v7x's 64 MiB VMEM.

    kernel = functools.partial(block_kernel, n_head=n_head, head_size=hs,
                               seq_len=T, eps=eps)

    out2 = pl.pallas_call(
        kernel,
        out_shape=jax.ShapeDtypeStruct((B * T, D), jnp.float32),
        grid=(B // bt,),
        in_specs=[
            pl.BlockSpec((R, D), lambda i: (i, 0)),        # x rows
            const_spec((1, D)), const_spec((1, D)),        # ln1 gamma/beta
            const_spec((D, 3 * D)),                        # fused Wqkv (bf16)
            const_spec((D, D)), const_spec((1, D)),        # proj W (bf16), proj b
            const_spec((1, D)), const_spec((1, D)),        # ln2 gamma/beta
            const_spec((D, H4)), const_spec((1, H4)),      # ffn W1 (bf16), b1
            const_spec((H4, D)), const_spec((1, D)),       # ffn W2 (bf16), b2
        ],
        out_specs=pl.BlockSpec((R, D), lambda i: (i, 0)),
        scratch_shapes=[pltpu.VMEM((R, D), jnp.float32)],  # head-concat buffer
        compiler_params=pltpu.CompilerParams(
            dimension_semantics=("parallel",),
            vmem_limit_bytes=64 * 1024 * 1024),
    )(x2, ln1g, ln1b, wqkv_b, wp_b, bp, ln2g, ln2b, w1_b, b1, w2_b, b2)

    return out2.reshape(B, T, D)


# ---------------- pure-JAX f32 reference (for correctness check) ----------------
def ref_block(x, params, n_head):
    (ln1g, ln1b, wq, wk, wv, wp, bp, ln2g, ln2b, w1, b1, w2, b2) = params
    B, T, D = x.shape

    def ln(y, g, b):
        mu = y.mean(-1, keepdims=True)
        var = ((y - mu) ** 2).mean(-1, keepdims=True)
        return (y - mu) / jnp.sqrt(var + 1e-5) * g + b

    xn = ln(x, ln1g, ln1b)
    q = jnp.einsum('btd,hde->bhte', xn, wq)
    k = jnp.einsum('btd,hde->bhte', xn, wk)
    v = jnp.einsum('btd,hde->bhte', xn, wv)
    wei = jnp.einsum('bhqe,bhke->bhqk', q, k) * D ** (-0.5)
    mask = jnp.tril(jnp.ones((T, T), bool))
    wei = jnp.where(mask, wei, -jnp.inf)
    wei = jax.nn.softmax(wei, axis=-1)
    out = jnp.einsum('bhqk,bhke->bhqe', wei, v)
    out = jnp.transpose(out, (0, 2, 1, 3)).reshape(B, T, D)
    sa = out @ wp + bp
    x1 = x + sa
    xn2 = ln(x1, ln2g, ln2b)
    ff = jnp.maximum(xn2 @ w1 + b1, 0.0) @ w2 + b2
    return x1 + ff


if __name__ == "__main__":
    B, T, D, n_head = 2, 8, 32, 4
    hs = D // n_head

    key = jax.random.PRNGKey(0)
    ks = jax.random.split(key, 10)
    scale = 0.02
    params = (
        jnp.ones((1, D), jnp.float32),                                    # ln1 gamma
        jnp.zeros((1, D), jnp.float32),                                   # ln1 beta
        scale * jax.random.normal(ks[0], (n_head, D, hs), jnp.float32),   # Wq (per head)
        scale * jax.random.normal(ks[1], (n_head, D, hs), jnp.float32),   # Wk
        scale * jax.random.normal(ks[2], (n_head, D, hs), jnp.float32),   # Wv
        scale * jax.random.normal(ks[3], (D, D), jnp.float32),            # proj W
        scale * jax.random.normal(ks[4], (1, D), jnp.float32),            # proj b
        jnp.ones((1, D), jnp.float32),                                    # ln2 gamma
        jnp.zeros((1, D), jnp.float32),                                   # ln2 beta
        scale * jax.random.normal(ks[5], (D, 4 * D), jnp.float32),        # ffn W1
        scale * jax.random.normal(ks[6], (1, 4 * D), jnp.float32),        # ffn b1
        scale * jax.random.normal(ks[7], (4 * D, D), jnp.float32),        # ffn W2
        scale * jax.random.normal(ks[8], (1, D), jnp.float32),            # ffn b2
    )
    x = jax.random.normal(ks[9], (B, T, D), jnp.float32)

    out = transformer_block(x, params, n_head)
    out = jax.block_until_ready(out)

    ref = ref_block(x, params, n_head)
    assert out.shape == (B, T, D)
    # bf16 matmul operands + approx reciprocal -> relaxed (but still tight) tolerance.
    max_err = float(jnp.max(jnp.abs(out - ref)))
    assert jnp.allclose(out, ref, atol=1e-2, rtol=1e-2), \
        f"mismatch vs reference (max abs err {max_err})"
    print("KERNEL_OK")
</pallas_src>

<mosaic_0001>
module attributes {stable_mosaic.version = 11 : i64} {
  func.func @block_kernel(%arg0: i32, %arg1: memref<16x32xf32, #tpu.memory_space<vmem>>, %arg2: memref<1x32xf32, #tpu.memory_space<vmem>>, %arg3: memref<1x32xf32, #tpu.memory_space<vmem>>, %arg4: memref<32x96xbf16, #tpu.memory_space<vmem>>, %arg5: memref<32x32xbf16, #tpu.memory_space<vmem>>, %arg6: memref<1x32xf32, #tpu.memory_space<vmem>>, %arg7: memref<1x32xf32, #tpu.memory_space<vmem>>, %arg8: memref<1x32xf32, #tpu.memory_space<vmem>>, %arg9: memref<32x128xbf16, #tpu.memory_space<vmem>>, %arg10: memref<1x128xf32, #tpu.memory_space<vmem>>, %arg11: memref<128x32xbf16, #tpu.memory_space<vmem>>, %arg12: memref<1x32xf32, #tpu.memory_space<vmem>>, %arg13: memref<16x32xf32, #tpu.memory_space<vmem>>, %arg14: memref<16x32xf32, #tpu.memory_space<vmem>>) attributes {dimension_semantics = [#tpu.dimension_semantics<parallel>], iteration_bounds = array<i64: 1>, scalar_prefetch = 0 : i64, scratch_operands = 1 : i64, tpu.core_type = #tpu.core_type<tc>, window_params = [{transform_indices = @transform_0, window_bounds = array<i64: 16, 32>}, {pipeline_mode = #tpu.pipeline_mode<synchronous>, transform_indices = @transform_1, window_bounds = array<i64: 1, 32>}, {pipeline_mode = #tpu.pipeline_mode<synchronous>, transform_indices = @transform_2, window_bounds = array<i64: 1, 32>}, {pipeline_mode = #tpu.pipeline_mode<synchronous>, transform_indices = @transform_3, window_bounds = array<i64: 32, 96>}, {pipeline_mode = #tpu.pipeline_mode<synchronous>, transform_indices = @transform_4, window_bounds = array<i64: 32, 32>}, {pipeline_mode = #tpu.pipeline_mode<synchronous>, transform_indices = @transform_5, window_bounds = array<i64: 1, 32>}, {pipeline_mode = #tpu.pipeline_mode<synchronous>, transform_indices = @transform_6, window_bounds = array<i64: 1, 32>}, {pipeline_mode = #tpu.pipeline_mode<synchronous>, transform_indices = @transform_7, window_bounds = array<i64: 1, 32>}, {pipeline_mode = #tpu.pipeline_mode<synchronous>, transform_indices = @transform_8, window_bounds = array<i64: 32, 128>}, {pipeline_mode = #tpu.pipeline_mode<synchronous>, transform_indices = @transform_9, window_bounds = array<i64: 1, 128>}, {pipeline_mode = #tpu.pipeline_mode<synchronous>, transform_indices = @transform_10, window_bounds = array<i64: 128, 32>}, {pipeline_mode = #tpu.pipeline_mode<synchronous>, transform_indices = @transform_11, window_bounds = array<i64: 1, 32>}, {transform_indices = @transform_12, window_bounds = array<i64: 16, 32>}]} {
    %c0 = arith.constant 0 : index
    %c0_0 = arith.constant 0 : index
    %0 = vector.load %arg1[%c0, %c0_0] : memref<16x32xf32, #tpu.memory_space<vmem>>, vector<16x32xf32>
    %cst = arith.constant dense<0.000000e+00> : vector<16xf32>
    %1 = vector.multi_reduction <add>, %0, %cst [1] : vector<16x32xf32> to vector<16xf32>
    %2 = vector.shape_cast %1 : vector<16xf32> to vector<16x1xf32>
    %cst_1 = arith.constant 3.200000e+01 : f32
    %3 = vector.broadcast %cst_1 : f32 to vector<16x1xf32>
    %4 = arith.divf %2, %3 : vector<16x1xf32>
    %5 = vector.broadcast %4 : vector<16x1xf32> to vector<16x32xf32>
    %6 = arith.subf %0, %5 : vector<16x32xf32>
    %7 = arith.mulf %6, %6 : vector<16x32xf32>
    %cst_2 = arith.constant dense<0.000000e+00> : vector<16xf32>
    %8 = vector.multi_reduction <add>, %7, %cst_2 [1] : vector<16x32xf32> to vector<16xf32>
    %9 = vector.shape_cast %8 : vector<16xf32> to vector<16x1xf32>
    %cst_3 = arith.constant 3.200000e+01 : f32
    %10 = vector.broadcast %cst_3 : f32 to vector<16x1xf32>
    %11 = arith.divf %9, %10 : vector<16x1xf32>
    %12 = vector.broadcast %4 : vector<16x1xf32> to vector<16x32xf32>
    %13 = arith.subf %0, %12 : vector<16x32xf32>
    %cst_4 = arith.constant 9.99999974E-6 : f32
    %14 = vector.broadcast %cst_4 : f32 to vector<16x1xf32>
    %15 = arith.addf %11, %14 : vector<16x1xf32>
    %16 = math.rsqrt %15 : vector<16x1xf32>
    %17 = vector.broadcast %16 : vector<16x1xf32> to vector<16x32xf32>
    %18 = arith.mulf %13, %17 : vector<16x32xf32>
    %c0_5 = arith.constant 0 : index
    %c0_6 = arith.constant 0 : index
    %19 = vector.load %arg2[%c0_5, %c0_6] : memref<1x32xf32, #tpu.memory_space<vmem>>, vector<1x32xf32>
    %20 = vector.broadcast %19 : vector<1x32xf32> to vector<16x32xf32>
    %21 = arith.mulf %18, %20 : vector<16x32xf32>
    %c0_7 = arith.constant 0 : index
    %c0_8 = arith.constant 0 : index
    %22 = vector.load %arg3[%c0_7, %c0_8] : memref<1x32xf32, #tpu.memory_space<vmem>>, vector<1x32xf32>
    %23 = vector.broadcast %22 : vector<1x32xf32> to vector<16x32xf32>
    %24 = arith.addf %21, %23 : vector<16x32xf32>
    %25 = arith.truncf %24 : vector<16x32xf32> to vector<16x32xbf16>
    %c0_9 = arith.constant 0 : index
    %c0_10 = arith.constant 0 : index
    %26 = vector.load %arg4[%c0_9, %c0_10] : memref<32x96xbf16, #tpu.memory_space<vmem>>, vector<32x96xbf16>
    %cst_11 = arith.constant dense<0.000000e+00> : vector<16x96xf32>
    %27 = tpu.matmul %25, %26, %cst_11 {dimension_numbers = #tpu.dot_dimension_numbers<[1], [0], [0], [1], [0, 0, 1, 1], [], []>} : vector<16x32xbf16>, vector<32x96xbf16>, vector<16x96xf32> -> vector<16x96xf32>
    %28 = tpu.iota {dimensions = array<i32: 0>} : vector<8x8xi32>
    %29 = tpu.iota {dimensions = array<i32: 1>} : vector<8x8xi32>
    %30 = arith.cmpi sle, %29, %28 : vector<8x8xi32>
    %31 = vector.extract_strided_slice %27 {offsets = [0, 0], sizes = [8, 8], strides = [1, 1]} : vector<16x96xf32> to vector<8x8xf32>
    %32 = arith.truncf %31 : vector<8x8xf32> to vector<8x8xbf16>
    %33 = vector.extract_strided_slice %27 {offsets = [0, 32], sizes = [8, 8], strides = [1, 1]} : vector<16x96xf32> to vector<8x8xf32>
    %34 = arith.truncf %33 : vector<8x8xf32> to vector<8x8xbf16>
    %35 = vector.extract_strided_slice %27 {offsets = [0, 64], sizes = [8, 8], strides = [1, 1]} : vector<16x96xf32> to vector<8x8xf32>
    %36 = arith.truncf %35 : vector<8x8xf32> to vector<8x8xbf16>
    %cst_12 = arith.constant dense<0.000000e+00> : vector<8x8xf32>
    %37 = tpu.matmul %32, %34, %cst_12 {dimension_numbers = #tpu.dot_dimension_numbers<[1], [1], [0], [0], [0, 0, 1, 0], [], []>} : vector<8x8xbf16>, vector<8x8xbf16>, vector<8x8xf32> -> vector<8x8xf32>
    %cst_13 = arith.constant 0.176776692 : f32
    %38 = vector.broadcast %cst_13 : f32 to vector<8x8xf32>
    %39 = arith.mulf %37, %38 : vector<8x8xf32>
    %cst_14 = arith.constant 0xFF800000 : f32
    %40 = vector.broadcast %cst_14 : f32 to vector<8x8xf32>
    %41 = arith.select %30, %39, %40 : vector<8x8xi1>, vector<8x8xf32>
    %cst_15 = arith.constant dense<0xFF800000> : vector<8xf32>
    %42 = vector.multi_reduction <maximumf>, %41, %cst_15 [1] : vector<8x8xf32> to vector<8xf32>
    %43 = vector.shape_cast %42 : vector<8xf32> to vector<8x1xf32>
    %44 = vector.broadcast %43 : vector<8x1xf32> to vector<8x8xf32>
    %45 = arith.subf %41, %44 : vector<8x8xf32>
    %46 = math.exp %45 : vector<8x8xf32>
    %cst_16 = arith.constant dense<0.000000e+00> : vector<8xf32>
    %47 = vector.multi_reduction <add>, %46, %cst_16 [1] : vector<8x8xf32> to vector<8xf32>
    %48 = vector.shape_cast %47 : vector<8xf32> to vector<8x1xf32>
    %49 = tpu.reciprocal %48 {approx = true} : vector<8x1xf32> -> vector<8x1xf32>
    %50 = vector.broadcast %49 : vector<8x1xf32> to vector<8x8xf32>
    %51 = arith.mulf %46, %50 : vector<8x8xf32>
    %52 = arith.truncf %51 : vector<8x8xf32> to vector<8x8xbf16>
    %cst_17 = arith.constant dense<0.000000e+00> : vector<8x8xf32>
    %53 = tpu.matmul %52, %36, %cst_17 {dimension_numbers = #tpu.dot_dimension_numbers<[1], [0], [0], [1], [0, 0, 1, 1], [], []>} : vector<8x8xbf16>, vector<8x8xbf16>, vector<8x8xf32> -> vector<8x8xf32>
    %c0_18 = arith.constant 0 : index
    %c0_19 = arith.constant 0 : index
    %54 = vector.load %arg14[%c0_18, %c0_19] : memref<16x32xf32, #tpu.memory_space<vmem>>, vector<8x8xf32>
    tpu.vector_store %arg14[%c0_18, %c0_19], %53 {strides = array<i32>} : memref<16x32xf32, #tpu.memory_space<vmem>>, vector<8x8xf32>,
    %55 = vector.extract_strided_slice %27 {offsets = [0, 8], sizes = [8, 8], strides = [1, 1]} : vector<16x96xf32> to vector<8x8xf32>
    %56 = arith.truncf %55 : vector<8x8xf32> to vector<8x8xbf16>
    %57 = vector.extract_strided_slice %27 {offsets = [0, 40], sizes = [8, 8], strides = [1, 1]} : vector<16x96xf32> to vector<8x8xf32>
    %58 = arith.truncf %57 : vector<8x8xf32> to vector<8x8xbf16>
    %59 = vector.extract_strided_slice %27 {offsets = [0, 72], sizes = [8, 8], strides = [1, 1]} : vector<16x96xf32> to vector<8x8xf32>
    %60 = arith.truncf %59 : vector<8x8xf32> to vector<8x8xbf16>
    %cst_20 = arith.constant dense<0.000000e+00> : vector<8x8xf32>
    %61 = tpu.matmul %56, %58, %cst_20 {dimension_numbers = #tpu.dot_dimension_numbers<[1], [1], [0], [0], [0, 0, 1, 0], [], []>} : vector<8x8xbf16>, vector<8x8xbf16>, vector<8x8xf32> -> vector<8x8xf32>
    %cst_21 = arith.constant 0.176776692 : f32
    %62 = vector.broadcast %cst_21 : f32 to vector<8x8xf32>
    %63 = arith.mulf %61, %62 : vector<8x8xf32>
    %cst_22 = arith.constant 0xFF800000 : f32
    %64 = vector.broadcast %cst_22 : f32 to vector<8x8xf32>
    %65 = arith.select %30, %63, %64 : vector<8x8xi1>, vector<8x8xf32>
    %cst_23 = arith.constant dense<0xFF800000> : vector<8xf32>
    %66 = vector.multi_reduction <maximumf>, %65, %cst_23 [1] : vector<8x8xf32> to vector<8xf32>
    %67 = vector.shape_cast %66 : vector<8xf32> to vector<8x1xf32>
    %68 = vector.broadcast %67 : vector<8x1xf32> to vector<8x8xf32>
    %69 = arith.subf %65, %68 : vector<8x8xf32>
    %70 = math.exp %69 : vector<8x8xf32>
    %cst_24 = arith.constant dense<0.000000e+00> : vector<8xf32>
    %71 = vector.multi_reduction <add>, %70, %cst_24 [1] : vector<8x8xf32> to vector<8xf32>
    %72 = vector.shape_cast %71 : vector<8xf32> to vector<8x1xf32>
    %73 = tpu.reciprocal %72 {approx = true} : vector<8x1xf32> -> vector<8x1xf32>
    %74 = vector.broadcast %73 : vector<8x1xf32> to vector<8x8xf32>
    %75 = arith.mulf %70, %74 : vector<8x8xf32>
    %76 = arith.truncf %75 : vector<8x8xf32> to vector<8x8xbf16>
    %cst_25 = arith.constant dense<0.000000e+00> : vector<8x8xf32>
    %77 = tpu.matmul %76, %60, %cst_25 {dimension_numbers = #tpu.dot_dimension_numbers<[1], [0], [0], [1], [0, 0, 1, 1], [], []>} : vector<8x8xbf16>, vector<8x8xbf16>, vector<8x8xf32> -> vector<8x8xf32>
    %c0_26 = arith.constant 0 : index
    %c8 = arith.constant 8 : index
    %78 = vector.load %arg14[%c0_26, %c8] : memref<16x32xf32, #tpu.memory_space<vmem>>, vector<8x8xf32>
    tpu.vector_store %arg14[%c0_26, %c8], %77 {strides = array<i32>} : memref<16x32xf32, #tpu.memory_space<vmem>>, vector<8x8xf32>,
    %79 = vector.extract_strided_slice %27 {offsets = [0, 16], sizes = [8, 8], strides = [1, 1]} : vector<16x96xf32> to vector<8x8xf32>
    %80 = arith.truncf %79 : vector<8x8xf32> to vector<8x8xbf16>
    %81 = vector.extract_strided_slice %27 {offsets = [0, 48], sizes = [8, 8], strides = [1, 1]} : vector<16x96xf32> to vector<8x8xf32>
    %82 = arith.truncf %81 : vector<8x8xf32> to vector<8x8xbf16>
    %83 = vector.extract_strided_slice %27 {offsets = [0, 80], sizes = [8, 8], strides = [1, 1]} : vector<16x96xf32> to vector<8x8xf32>
    %84 = arith.truncf %83 : vector<8x8xf32> to vector<8x8xbf16>
    %cst_27 = arith.constant dense<0.000000e+00> : vector<8x8xf32>
    %85 = tpu.matmul %80, %82, %cst_27 {dimension_numbers = #tpu.dot_dimension_numbers<[1], [1], [0], [0], [0, 0, 1, 0], [], []>} : vector<8x8xbf16>, vector<8x8xbf16>, vector<8x8xf32> -> vector<8x8xf32>
    %cst_28 = arith.constant 0.176776692 : f32
    %86 = vector.broadcast %cst_28 : f32 to vector<8x8xf32>
    %87 = arith.mulf %85, %86 : vector<8x8xf32>
    %cst_29 = arith.constant 0xFF800000 : f32
    %88 = vector.broadcast %cst_29 : f32 to vector<8x8xf32>
    %89 = arith.select %30, %87, %88 : vector<8x8xi1>, vector<8x8xf32>
    %cst_30 = arith.constant dense<0xFF800000> : vector<8xf32>
    %90 = vector.multi_reduction <maximumf>, %89, %cst_30 [1] : vector<8x8xf32> to vector<8xf32>
    %91 = vector.shape_cast %90 : vector<8xf32> to vector<8x1xf32>
    %92 = vector.broadcast %91 : vector<8x1xf32> to vector<8x8xf32>
    %93 = arith.subf %89, %92 : vector<8x8xf32>
    %94 = math.exp %93 : vector<8x8xf32>
    %cst_31 = arith.constant dense<0.000000e+00> : vector<8xf32>
    %95 = vector.multi_reduction <add>, %94, %cst_31 [1] : vector<8x8xf32> to vector<8xf32>
    %96 = vector.shape_cast %95 : vector<8xf32> to vector<8x1xf32>
    %97 = tpu.reciprocal %96 {approx = true} : vector<8x1xf32> -> vector<8x1xf32>
    %98 = vector.broadcast %97 : vector<8x1xf32> to vector<8x8xf32>
    %99 = arith.mulf %94, %98 : vector<8x8xf32>
    %100 = arith.truncf %99 : vector<8x8xf32> to vector<8x8xbf16>
    %cst_32 = arith.constant dense<0.000000e+00> : vector<8x8xf32>
    %101 = tpu.matmul %100, %84, %cst_32 {dimension_numbers = #tpu.dot_dimension_numbers<[1], [0], [0], [1], [0, 0, 1, 1], [], []>} : vector<8x8xbf16>, vector<8x8xbf16>, vector<8x8xf32> -> vector<8x8xf32>
    %c0_33 = arith.constant 0 : index
    %c16 = arith.constant 16 : index
    %102 = vector.load %arg14[%c0_33, %c16] : memref<16x32xf32, #tpu.memory_space<vmem>>, vector<8x8xf32>
    tpu.vector_store %arg14[%c0_33, %c16], %101 {strides = array<i32>} : memref<16x32xf32, #tpu.memory_space<vmem>>, vector<8x8xf32>,
    %103 = vector.extract_strided_slice %27 {offsets = [0, 24], sizes = [8, 8], strides = [1, 1]} : vector<16x96xf32> to vector<8x8xf32>
    %104 = arith.truncf %103 : vector<8x8xf32> to vector<8x8xbf16>
    %105 = vector.extract_strided_slice %27 {offsets = [0, 56], sizes = [8, 8], strides = [1, 1]} : vector<16x96xf32> to vector<8x8xf32>
    %106 = arith.truncf %105 : vector<8x8xf32> to vector<8x8xbf16>
    %107 = vector.extract_strided_slice %27 {offsets = [0, 88], sizes = [8, 8], strides = [1, 1]} : vector<16x96xf32> to vector<8x8xf32>
    %108 = arith.truncf %107 : vector<8x8xf32> to vector<8x8xbf16>
    %cst_34 = arith.constant dense<0.000000e+00> : vector<8x8xf32>
    %109 = tpu.matmul %104, %106, %cst_34 {dimension_numbers = #tpu.dot_dimension_numbers<[1], [1], [0], [0], [0, 0, 1, 0], [], []>} : vector<8x8xbf16>, vector<8x8xbf16>, vector<8x8xf32> -> vector<8x8xf32>
    %cst_35 = arith.constant 0.176776692 : f32
    %110 = vector.broadcast %cst_35 : f32 to vector<8x8xf32>
    %111 = arith.mulf %109, %110 : vector<8x8xf32>
    %cst_36 = arith.constant 0xFF800000 : f32
    %112 = vector.broadcast %cst_36 : f32 to vector<8x8xf32>
    %113 = arith.select %30, %111, %112 : vector<8x8xi1>, vector<8x8xf32>
    %cst_37 = arith.constant dense<0xFF800000> : vector<8xf32>
    %114 = vector.multi_reduction <maximumf>, %113, %cst_37 [1] : vector<8x8xf32> to vector<8xf32>
    %115 = vector.shape_cast %114 : vector<8xf32> to vector<8x1xf32>
    %116 = vector.broadcast %115 : vector<8x1xf32> to vector<8x8xf32>
    %117 = arith.subf %113, %116 : vector<8x8xf32>
    %118 = math.exp %117 : vector<8x8xf32>
    %cst_38 = arith.constant dense<0.000000e+00> : vector<8xf32>
    %119 = vector.multi_reduction <add>, %118, %cst_38 [1] : vector<8x8xf32> to vector<8xf32>
    %120 = vector.shape_cast %119 : vector<8xf32> to vector<8x1xf32>
    %121 = tpu.reciprocal %120 {approx = true} : vector<8x1xf32> -> vector<8x1xf32>
    %122 = vector.broadcast %121 : vector<8x1xf32> to vector<8x8xf32>
    %123 = arith.mulf %118, %122 : vector<8x8xf32>
    %124 = arith.truncf %123 : vector<8x8xf32> to vector<8x8xbf16>
    %cst_39 = arith.constant dense<0.000000e+00> : vector<8x8xf32>
    %125 = tpu.matmul %124, %108, %cst_39 {dimension_numbers = #tpu.dot_dimension_numbers<[1], [0], [0], [1], [0, 0, 1, 1], [], []>} : vector<8x8xbf16>, vector<8x8xbf16>, vector<8x8xf32> -> vector<8x8xf32>
    %c0_40 = arith.constant 0 : index
    %c24 = arith.constant 24 : index
    %126 = vector.load %arg14[%c0_40, %c24] : memref<16x32xf32, #tpu.memory_space<vmem>>, vector<8x8xf32>
    tpu.vector_store %arg14[%c0_40, %c24], %125 {strides = array<i32>} : memref<16x32xf32, #tpu.memory_space<vmem>>, vector<8x8xf32>,
    %127 = vector.extract_strided_slice %27 {offsets = [8, 0], sizes = [8, 8], strides = [1, 1]} : vector<16x96xf32> to vector<8x8xf32>
    %128 = arith.truncf %127 : vector<8x8xf32> to vector<8x8xbf16>
    %129 = vector.extract_strided_slice %27 {offsets = [8, 32], sizes = [8, 8], strides = [1, 1]} : vector<16x96xf32> to vector<8x8xf32>
    %130 = arith.truncf %129 : vector<8x8xf32> to vector<8x8xbf16>
    %131 = vector.extract_strided_slice %27 {offsets = [8, 64], sizes = [8, 8], strides = [1, 1]} : vector<16x96xf32> to vector<8x8xf32>
    %132 = arith.truncf %131 : vector<8x8xf32> to vector<8x8xbf16>
    %cst_41 = arith.constant dense<0.000000e+00> : vector<8x8xf32>
    %133 = tpu.matmul %128, %130, %cst_41 {dimension_numbers = #tpu.dot_dimension_numbers<[1], [1], [0], [0], [0, 0, 1, 0], [], []>} : vector<8x8xbf16>, vector<8x8xbf16>, vector<8x8xf32> -> vector<8x8xf32>
    %cst_42 = arith.constant 0.176776692 : f32
    %134 = vector.broadcast %cst_42 : f32 to vector<8x8xf32>
    %135 = arith.mulf %133, %134 : vector<8x8xf32>
    %cst_43 = arith.constant 0xFF800000 : f32
    %136 = vector.broadcast %cst_43 : f32 to vector<8x8xf32>
    %137 = arith.select %30, %135, %136 : vector<8x8xi1>, vector<8x8xf32>
    %cst_44 = arith.constant dense<0xFF800000> : vector<8xf32>
    %138 = vector.multi_reduction <maximumf>, %137, %cst_44 [1] : vector<8x8xf32> to vector<8xf32>
    %139 = vector.shape_cast %138 : vector<8xf32> to vector<8x1xf32>
    %140 = vector.broadcast %139 : vector<8x1xf32> to vector<8x8xf32>
    %141 = arith.subf %137, %140 : vector<8x8xf32>
    %142 = math.exp %141 : vector<8x8xf32>
    %cst_45 = arith.constant dense<0.000000e+00> : vector<8xf32>
    %143 = vector.multi_reduction <add>, %142, %cst_45 [1] : vector<8x8xf32> to vector<8xf32>
    %144 = vector.shape_cast %143 : vector<8xf32> to vector<8x1xf32>
    %145 = tpu.reciprocal %144 {approx = true} : vector<8x1xf32> -> vector<8x1xf32>
    %146 = vector.broadcast %145 : vector<8x1xf32> to vector<8x8xf32>
    %147 = arith.mulf %142, %146 : vector<8x8xf32>
    %148 = arith.truncf %147 : vector<8x8xf32> to vector<8x8xbf16>
    %cst_46 = arith.constant dense<0.000000e+00> : vector<8x8xf32>
    %149 = tpu.matmul %148, %132, %cst_46 {dimension_numbers = #tpu.dot_dimension_numbers<[1], [0], [0], [1], [0, 0, 1, 1], [], []>} : vector<8x8xbf16>, vector<8x8xbf16>, vector<8x8xf32> -> vector<8x8xf32>
    %c8_47 = arith.constant 8 : index
    %c0_48 = arith.constant 0 : index
    %150 = vector.load %arg14[%c8_47, %c0_48] : memref<16x32xf32, #tpu.memory_space<vmem>>, vector<8x8xf32>
    tpu.vector_store %arg14[%c8_47, %c0_48], %149 {strides = array<i32>} : memref<16x32xf32, #tpu.memory_space<vmem>>, vector<8x8xf32>,
    %151 = vector.extract_strided_slice %27 {offsets = [8, 8], sizes = [8, 8], strides = [1, 1]} : vector<16x96xf32> to vector<8x8xf32>
    %152 = arith.truncf %151 : vector<8x8xf32> to vector<8x8xbf16>
    %153 = vector.extract_strided_slice %27 {offsets = [8, 40], sizes = [8, 8], strides = [1, 1]} : vector<16x96xf32> to vector<8x8xf32>
    %154 = arith.truncf %153 : vector<8x8xf32> to vector<8x8xbf16>
    %155 = vector.extract_strided_slice %27 {offsets = [8, 72], sizes = [8, 8], strides = [1, 1]} : vector<16x96xf32> to vector<8x8xf32>
    %156 = arith.truncf %155 : vector<8x8xf32> to vector<8x8xbf16>
    %cst_49 = arith.constant dense<0.000000e+00> : vector<8x8xf32>
    %157 = tpu.matmul %152, %154, %cst_49 {dimension_numbers = #tpu.dot_dimension_numbers<[1], [1], [0], [0], [0, 0, 1, 0], [], []>} : vector<8x8xbf16>, vector<8x8xbf16>, vector<8x8xf32> -> vector<8x8xf32>
    %cst_50 = arith.constant 0.176776692 : f32
    %158 = vector.broadcast %cst_50 : f32 to vector<8x8xf32>
    %159 = arith.mulf %157, %158 : vector<8x8xf32>
    %cst_51 = arith.constant 0xFF800000 : f32
    %160 = vector.broadcast %cst_51 : f32 to vector<8x8xf32>
    %161 = arith.select %30, %159, %160 : vector<8x8xi1>, vector<8x8xf32>
    %cst_52 = arith.constant dense<0xFF800000> : vector<8xf32>
    %162 = vector.multi_reduction <maximumf>, %161, %cst_52 [1] : vector<8x8xf32> to vector<8xf32>
    %163 = vector.shape_cast %162 : vector<8xf32> to vector<8x1xf32>
    %164 = vector.broadcast %163 : vector<8x1xf32> to vector<8x8xf32>
    %165 = arith.subf %161, %164 : vector<8x8xf32>
    %166 = math.exp %165 : vector<8x8xf32>
    %cst_53 = arith.constant dense<0.000000e+00> : vector<8xf32>
    %167 = vector.multi_reduction <add>, %166, %cst_53 [1] : vector<8x8xf32> to vector<8xf32>
    %168 = vector.shape_cast %167 : vector<8xf32> to vector<8x1xf32>
    %169 = tpu.reciprocal %168 {approx = true} : vector<8x1xf32> -> vector<8x1xf32>
    %170 = vector.broadcast %169 : vector<8x1xf32> to vector<8x8xf32>
    %171 = arith.mulf %166, %170 : vector<8x8xf32>
    %172 = arith.truncf %171 : vector<8x8xf32> to vector<8x8xbf16>
    %cst_54 = arith.constant dense<0.000000e+00> : vector<8x8xf32>
    %173 = tpu.matmul %172, %156, %cst_54 {dimension_numbers = #tpu.dot_dimension_numbers<[1], [0], [0], [1], [0, 0, 1, 1], [], []>} : vector<8x8xbf16>, vector<8x8xbf16>, vector<8x8xf32> -> vector<8x8xf32>
    %c8_55 = arith.constant 8 : index
    %c8_56 = arith.constant 8 : index
    %174 = vector.load %arg14[%c8_55, %c8_56] : memref<16x32xf32, #tpu.memory_space<vmem>>, vector<8x8xf32>
    tpu.vector_store %arg14[%c8_55, %c8_56], %173 {strides = array<i32>} : memref<16x32xf32, #tpu.memory_space<vmem>>, vector<8x8xf32>,
    %175 = vector.extract_strided_slice %27 {offsets = [8, 16], sizes = [8, 8], strides = [1, 1]} : vector<16x96xf32> to vector<8x8xf32>
    %176 = arith.truncf %175 : vector<8x8xf32> to vector<8x8xbf16>
    %177 = vector.extract_strided_slice %27 {offsets = [8, 48], sizes = [8, 8], strides = [1, 1]} : vector<16x96xf32> to vector<8x8xf32>
    %178 = arith.truncf %177 : vector<8x8xf32> to vector<8x8xbf16>
    %179 = vector.extract_strided_slice %27 {offsets = [8, 80], sizes = [8, 8], strides = [1, 1]} : vector<16x96xf32> to vector<8x8xf32>
    %180 = arith.truncf %179 : vector<8x8xf32> to vector<8x8xbf16>
    %cst_57 = arith.constant dense<0.000000e+00> : vector<8x8xf32>
    %181 = tpu.matmul %176, %178, %cst_57 {dimension_numbers = #tpu.dot_dimension_numbers<[1], [1], [0], [0], [0, 0, 1, 0], [], []>} : vector<8x8xbf16>, vector<8x8xbf16>, vector<8x8xf32> -> vector<8x8xf32>
    %cst_58 = arith.constant 0.176776692 : f32
    %182 = vector.broadcast %cst_58 : f32 to vector<8x8xf32>
    %183 = arith.mulf %181, %182 : vector<8x8xf32>
    %cst_59 = arith.constant 0xFF800000 : f32
    %184 = vector.broadcast %cst_59 : f32 to vector<8x8xf32>
    %185 = arith.select %30, %183, %184 : vector<8x8xi1>, vector<8x8xf32>
    %cst_60 = arith.constant dense<0xFF800000> : vector<8xf32>
    %186 = vector.multi_reduction <maximumf>, %185, %cst_60 [1] : vector<8x8xf32> to vector<8xf32>
    %187 = vector.shape_cast %186 : vector<8xf32> to vector<8x1xf32>
    %188 = vector.broadcast %187 : vector<8x1xf32> to vector<8x8xf32>
    %189 = arith.subf %185, %188 : vector<8x8xf32>
    %190 = math.exp %189 : vector<8x8xf32>
    %cst_61 = arith.constant dense<0.000000e+00> : vector<8xf32>
    %191 = vector.multi_reduction <add>, %190, %cst_61 [1] : vector<8x8xf32> to vector<8xf32>
    %192 = vector.shape_cast %191 : vector<8xf32> to vector<8x1xf32>
    %193 = tpu.reciprocal %192 {approx = true} : vector<8x1xf32> -> vector<8x1xf32>
    %194 = vector.broadcast %193 : vector<8x1xf32> to vector<8x8xf32>
    %195 = arith.mulf %190, %194 : vector<8x8xf32>
    %196 = arith.truncf %195 : vector<8x8xf32> to vector<8x8xbf16>
    %cst_62 = arith.constant dense<0.000000e+00> : vector<8x8xf32>
    %197 = tpu.matmul %196, %180, %cst_62 {dimension_numbers = #tpu.dot_dimension_numbers<[1], [0], [0], [1], [0, 0, 1, 1], [], []>} : vector<8x8xbf16>, vector<8x8xbf16>, vector<8x8xf32> -> vector<8x8xf32>
    %c8_63 = arith.constant 8 : index
    %c16_64 = arith.constant 16 : index
    %198 = vector.load %arg14[%c8_63, %c16_64] : memref<16x32xf32, #tpu.memory_space<vmem>>, vector<8x8xf32>
    tpu.vector_store %arg14[%c8_63, %c16_64], %197 {strides = array<i32>} : memref<16x32xf32, #tpu.memory_space<vmem>>, vector<8x8xf32>,
    %199 = vector.extract_strided_slice %27 {offsets = [8, 24], sizes = [8, 8], strides = [1, 1]} : vector<16x96xf32> to vector<8x8xf32>
    %200 = arith.truncf %199 : vector<8x8xf32> to vector<8x8xbf16>
    %201 = vector.extract_strided_slice %27 {offsets = [8, 56], sizes = [8, 8], strides = [1, 1]} : vector<16x96xf32> to vector<8x8xf32>
    %202 = arith.truncf %201 : vector<8x8xf32> to vector<8x8xbf16>
    %203 = vector.extract_strided_slice %27 {offsets = [8, 88], sizes = [8, 8], strides = [1, 1]} : vector<16x96xf32> to vector<8x8xf32>
    %204 = arith.truncf %203 : vector<8x8xf32> to vector<8x8xbf16>
    %cst_65 = arith.constant dense<0.000000e+00> : vector<8x8xf32>
    %205 = tpu.matmul %200, %202, %cst_65 {dimension_numbers = #tpu.dot_dimension_numbers<[1], [1], [0], [0], [0, 0, 1, 0], [], []>} : vector<8x8xbf16>, vector<8x8xbf16>, vector<8x8xf32> -> vector<8x8xf32>
    %cst_66 = arith.constant 0.176776692 : f32
    %206 = vector.broadcast %cst_66 : f32 to vector<8x8xf32>
    %207 = arith.mulf %205, %206 : vector<8x8xf32>
    %cst_67 = arith.constant 0xFF800000 : f32
    %208 = vector.broadcast %cst_67 : f32 to vector<8x8xf32>
    %209 = arith.select %30, %207, %208 : vector<8x8xi1>, vector<8x8xf32>
    %cst_68 = arith.constant dense<0xFF800000> : vector<8xf32>
    %210 = vector.multi_reduction <maximumf>, %209, %cst_68 [1] : vector<8x8xf32> to vector<8xf32>
    %211 = vector.shape_cast %210 : vector<8xf32> to vector<8x1xf32>
    %212 = vector.broadcast %211 : vector<8x1xf32> to vector<8x8xf32>
    %213 = arith.subf %209, %212 : vector<8x8xf32>
    %214 = math.exp %213 : vector<8x8xf32>
    %cst_69 = arith.constant dense<0.000000e+00> : vector<8xf32>
    %215 = vector.multi_reduction <add>, %214, %cst_69 [1] : vector<8x8xf32> to vector<8xf32>
    %216 = vector.shape_cast %215 : vector<8xf32> to vector<8x1xf32>
    %217 = tpu.reciprocal %216 {approx = true} : vector<8x1xf32> -> vector<8x1xf32>
    %218 = vector.broadcast %217 : vector<8x1xf32> to vector<8x8xf32>
    %219 = arith.mulf %214, %218 : vector<8x8xf32>
    %220 = arith.truncf %219 : vector<8x8xf32> to vector<8x8xbf16>
    %cst_70 = arith.constant dense<0.000000e+00> : vector<8x8xf32>
    %221 = tpu.matmul %220, %204, %cst_70 {dimension_numbers = #tpu.dot_dimension_numbers<[1], [0], [0], [1], [0, 0, 1, 1], [], []>} : vector<8x8xbf16>, vector<8x8xbf16>, vector<8x8xf32> -> vector<8x8xf32>
    %c8_71 = arith.constant 8 : index
    %c24_72 = arith.constant 24 : index
    %222 = vector.load %arg14[%c8_71, %c24_72] : memref<16x32xf32, #tpu.memory_space<vmem>>, vector<8x8xf32>
    tpu.vector_store %arg14[%c8_71, %c24_72], %221 {strides = array<i32>} : memref<16x32xf32, #tpu.memory_space<vmem>>, vector<8x8xf32>,
    %c0_73 = arith.constant 0 : index
    %c0_74 = arith.constant 0 : index
    %223 = vector.load %arg14[%c0_73, %c0_74] : memref<16x32xf32, #tpu.memory_space<vmem>>, vector<16x32xf32>
    %224 = arith.truncf %223 : vector<16x32xf32> to vector<16x32xbf16>
    %c0_75 = arith.constant 0 : index
    %c0_76 = arith.constant 0 : index
    %225 = vector.load %arg5[%c0_75, %c0_76] : memref<32x32xbf16, #tpu.memory_space<vmem>>, vector<32x32xbf16>
    %cst_77 = arith.constant dense<0.000000e+00> : vector<16x32xf32>
    %226 = tpu.matmul %224, %225, %cst_77 {dimension_numbers = #tpu.dot_dimension_numbers<[1], [0], [0], [1], [0, 0, 1, 1], [], []>} : vector<16x32xbf16>, vector<32x32xbf16>, vector<16x32xf32> -> vector<16x32xf32>
    %c0_78 = arith.constant 0 : index
    %c0_79 = arith.constant 0 : index
    %227 = vector.load %arg6[%c0_78, %c0_79] : memref<1x32xf32, #tpu.memory_space<vmem>>, vector<1x32xf32>
    %228 = vector.broadcast %227 : vector<1x32xf32> to vector<16x32xf32>
    %229 = arith.addf %226, %228 : vector<16x32xf32>
    %230 = arith.addf %0, %229 : vector<16x32xf32>
    %cst_80 = arith.constant dense<0.000000e+00> : vector<16xf32>
    %231 = vector.multi_reduction <add>, %230, %cst_80 [1] : vector<16x32xf32> to vector<16xf32>
    %232 = vector.shape_cast %231 : vector<16xf32> to vector<16x1xf32>
    %cst_81 = arith.constant 3.200000e+01 : f32
    %233 = vector.broadcast %cst_81 : f32 to vector<16x1xf32>
    %234 = arith.divf %232, %233 : vector<16x1xf32>
    %235 = vector.broadcast %234 : vector<16x1xf32> to vector<16x32xf32>
    %236 = arith.subf %230, %235 : vector<16x32xf32>
    %237 = arith.mulf %236, %236 : vector<16x32xf32>
    %cst_82 = arith.constant dense<0.000000e+00> : vector<16xf32>
    %238 = vector.multi_reduction <add>, %237, %cst_82 [1] : vector<16x32xf32> to vector<16xf32>
    %239 = vector.shape_cast %238 : vector<16xf32> to vector<16x1xf32>
    %cst_83 = arith.constant 3.200000e+01 : f32
    %240 = vector.broadcast %cst_83 : f32 to vector<16x1xf32>
    %241 = arith.divf %239, %240 : vector<16x1xf32>
    %242 = vector.broadcast %234 : vector<16x1xf32> to vector<16x32xf32>
    %243 = arith.subf %230, %242 : vector<16x32xf32>
    %cst_84 = arith.constant 9.99999974E-6 : f32
    %244 = vector.broadcast %cst_84 : f32 to vector<16x1xf32>
    %245 = arith.addf %241, %244 : vector<16x1xf32>
    %246 = math.rsqrt %245 : vector<16x1xf32>
    %247 = vector.broadcast %246 : vector<16x1xf32> to vector<16x32xf32>
    %248 = arith.mulf %243, %247 : vector<16x32xf32>
    %c0_85 = arith.constant 0 : index
    %c0_86 = arith.constant 0 : index
    %249 = vector.load %arg7[%c0_85, %c0_86] : memref<1x32xf32, #tpu.memory_space<vmem>>, vector<1x32xf32>
    %250 = vector.broadcast %249 : vector<1x32xf32> to vector<16x32xf32>
    %251 = arith.mulf %248, %250 : vector<16x32xf32>
    %c0_87 = arith.constant 0 : index
    %c0_88 = arith.constant 0 : index
    %252 = vector.load %arg8[%c0_87, %c0_88] : memref<1x32xf32, #tpu.memory_space<vmem>>, vector<1x32xf32>
    %253 = vector.broadcast %252 : vector<1x32xf32> to vector<16x32xf32>
    %254 = arith.addf %251, %253 : vector<16x32xf32>
    %255 = arith.truncf %254 : vector<16x32xf32> to vector<16x32xbf16>
    %c0_89 = arith.constant 0 : index
    %c0_90 = arith.constant 0 : index
    %256 = vector.load %arg9[%c0_89, %c0_90] : memref<32x128xbf16, #tpu.memory_space<vmem>>, vector<32x128xbf16>
    %cst_91 = arith.constant dense<0.000000e+00> : vector<16x128xf32>
    %257 = tpu.matmul %255, %256, %cst_91 {dimension_numbers = #tpu.dot_dimension_numbers<[1], [0], [0], [1], [0, 0, 1, 1], [], []>} : vector<16x32xbf16>, vector<32x128xbf16>, vector<16x128xf32> -> vector<16x128xf32>
    %c0_92 = arith.constant 0 : index
    %c0_93 = arith.constant 0 : index
    %258 = vector.load %arg10[%c0_92, %c0_93] : memref<1x128xf32, #tpu.memory_space<vmem>>, vector<1x128xf32>
    %259 = vector.broadcast %258 : vector<1x128xf32> to vector<16x128xf32>
    %260 = arith.addf %257, %259 : vector<16x128xf32>
    %cst_94 = arith.constant 0.000000e+00 : f32
    %261 = vector.broadcast %cst_94 : f32 to vector<16x128xf32>
    %262 = arith.maximumf %260, %261 : vector<16x128xf32>
    %263 = arith.truncf %262 : vector<16x128xf32> to vector<16x128xbf16>
    %c0_95 = arith.constant 0 : index
    %c0_96 = arith.constant 0 : index
    %264 = vector.load %arg11[%c0_95, %c0_96] : memref<128x32xbf16, #tpu.memory_space<vmem>>, vector<128x32xbf16>
    %cst_97 = arith.constant dense<0.000000e+00> : vector<16x32xf32>
    %265 = tpu.matmul %263, %264, %cst_97 {dimension_numbers = #tpu.dot_dimension_numbers<[1], [0], [0], [1], [0, 0, 1, 1], [], []>} : vector<16x128xbf16>, vector<128x32xbf16>, vector<16x32xf32> -> vector<16x32xf32>
    %c0_98 = arith.constant 0 : index
    %c0_99 = arith.constant 0 : index
    %266 = vector.load %arg12[%c0_98, %c0_99] : memref<1x32xf32, #tpu.memory_space<vmem>>, vector<1x32xf32>
    %267 = vector.broadcast %266 : vector<1x32xf32> to vector<16x32xf32>
    %268 = arith.addf %265, %267 : vector<16x32xf32>
    %269 = arith.addf %230, %268 : vector<16x32xf32>
    %c0_100 = arith.constant 0 : index
    %c0_101 = arith.constant 0 : index
    %270 = vector.load %arg13[%c0_100, %c0_101] : memref<16x32xf32, #tpu.memory_space<vmem>>, vector<16x32xf32>
    tpu.vector_store %arg13[%c0_100, %c0_101], %269 {strides = array<i32>} : memref<16x32xf32, #tpu.memory_space<vmem>>, vector<16x32xf32>,
    return
  }
  func.func @transform_0(%arg0: i32) -> (i32, i32) {
    %c0_i32 = arith.constant 0 : i32
    %c0_i32_0 = arith.constant 0 : i32
    return %arg0, %c0_i32 : i32, i32
  }
  func.func @transform_1(%arg0: i32) -> (i32, i32) {
    %c0_i32 = arith.constant 0 : i32
    %c0_i32_0 = arith.constant 0 : i32
    %c0_i32_1 = arith.constant 0 : i32
    return %c0_i32, %c0_i32_0 : i32, i32
  }
  func.func @transform_2(%arg0: i32) -> (i32, i32) {
    %c0_i32 = arith.constant 0 : i32
    %c0_i32_0 = arith.constant 0 : i32
    %c0_i32_1 = arith.constant 0 : i32
    return %c0_i32, %c0_i32_0 : i32, i32
  }
  func.func @transform_3(%arg0: i32) -> (i32, i32) {
    %c0_i32 = arith.constant 0 : i32
    %c0_i32_0 = arith.constant 0 : i32
    %c0_i32_1 = arith.constant 0 : i32
    return %c0_i32, %c0_i32_0 : i32, i32
  }
  func.func @transform_4(%arg0: i32) -> (i32, i32) {
    %c0_i32 = arith.constant 0 : i32
    %c0_i32_0 = arith.constant 0 : i32
    %c0_i32_1 = arith.constant 0 : i32
    return %c0_i32, %c0_i32_0 : i32, i32
  }
  func.func @transform_5(%arg0: i32) -> (i32, i32) {
    %c0_i32 = arith.constant 0 : i32
    %c0_i32_0 = arith.constant 0 : i32
    %c0_i32_1 = arith.constant 0 : i32
    return %c0_i32, %c0_i32_0 : i32, i32
  }
  func.func @transform_6(%arg0: i32) -> (i32, i32) {
    %c0_i32 = arith.constant 0 : i32
    %c0_i32_0 = arith.constant 0 : i32
    %c0_i32_1 = arith.constant 0 : i32
    return %c0_i32, %c0_i32_0 : i32, i32
  }
  func.func @transform_7(%arg0: i32) -> (i32, i32) {
    %c0_i32 = arith.constant 0 : i32
    %c0_i32_0 = arith.constant 0 : i32
    %c0_i32_1 = arith.constant 0 : i32
    return %c0_i32, %c0_i32_0 : i32, i32
  }
  func.func @transform_8(%arg0: i32) -> (i32, i32) {
    %c0_i32 = arith.constant 0 : i32
    %c0_i32_0 = arith.constant 0 : i32
    %c0_i32_1 = arith.constant 0 : i32
    return %c0_i32, %c0_i32_0 : i32, i32
  }
  func.func @transform_9(%arg0: i32) -> (i32, i32) {
    %c0_i32 = arith.constant 0 : i32
    %c0_i32_0 = arith.constant 0 : i32
    %c0_i32_1 = arith.constant 0 : i32
    return %c0_i32, %c0_i32_0 : i32, i32
  }
  func.func @transform_10(%arg0: i32) -> (i32, i32) {
    %c0_i32 = arith.constant 0 : i32
    %c0_i32_0 = arith.constant 0 : i32
    %c0_i32_1 = arith.constant 0 : i32
    return %c0_i32, %c0_i32_0 : i32, i32
  }
  func.func @transform_11(%arg0: i32) -> (i32, i32) {
    %c0_i32 = arith.constant 0 : i32
    %c0_i32_0 = arith.constant 0 : i32
    %c0_i32_1 = arith.constant 0 : i32
    return %c0_i32, %c0_i32_0 : i32, i32
  }
  func.func @transform_12(%arg0: i32) -> (i32, i32) {
    %c0_i32 = arith.constant 0 : i32
    %c0_i32_0 = arith.constant 0 : i32
    return %arg0, %c0_i32 : i32, i32
  }
}

</mosaic_0001>

<bundles_post_ra>
// kernel: tpu_custom_call.1
= control target key start
LH: loop header
LB: loop body
LE: loop exit
PB: predicated region body
PF: predicated region fallthrough
CT: control target
= control target key end

     0   :  { %vm45_vm0 = vcmask 261120   ;;  %s1397_s0 = inlined_call_operand.vmem [shape: f32[16,32], index: 0, kind: input, shape index: {}]   ;;  %s1398_s1 = inlined_call_operand.vmem [shape: f32[1,32], index: 1, kind: input, shape index: {}]   ;;  %s1399_s2 = inlined_call_operand.vmem [shape: f32[1,32], index: 2, kind: input, shape index: {}]   ;;  %s1400_s3 = inlined_call_operand.vmem [shape: bf16[32,96], index: 3, kind: input, shape index: {}]   ;;  %s1401_s4 = inlined_call_operand.vmem [shape: bf16[32,32], index: 4, kind: input, shape index: {}]   ;;  %s1402_s5 = inlined_call_operand.vmem [shape: f32[1,32], index: 5, kind: input, shape index: {}]   ;;  %s1403_s6 = inlined_call_operand.vmem [shape: f32[1,32], index: 6, kind: input, shape index: {}]   ;;  %s1404_s7 = inlined_call_operand.vmem [shape: f32[1,32], index: 7, kind: input, shape index: {}]   ;;  %s1405_s8 = inlined_call_operand.vmem [shape: bf16[32,128], index: 8, kind: input, shape index: {}]   ;;  %s1406_s9 = inlined_call_operand.vmem [shape: f32[1,128], index: 9, kind: input, shape index: {}]   ;;  %s1407_s10 = inlined_call_operand.vmem [shape: bf16[128,32], index: 10, kind: input, shape index: {}]   ;;  %s1408_s11 = inlined_call_operand.vmem [shape: f32[1,32], index: 11, kind: input, shape index: {}]   ;;  %s1409_s12 = inlined_call_operand.hbm [shape: f32[16,32], index: 12, kind: output, shape index: {}]  }
   0x1   :  { %v1158_v0 = vld [vmem:[%s1397_s0] sm:$0xff] }
   0x2   :  { %v46_v1 = vsel %vm45_vm0, %v1158_v0, 0.0 }
   0x3   :  { %47 = vadd.xlane.f32.xlu0 %v46_v1 }
   0x4   :  { %17 = vsyncpa [#allocation4], 0  ;;  %v1165_v2 = vld [vmem:[%s1397_s0 + $0x8] sm:$0xff]  ;;  %v1073_v4 = vmov 32.0   ;;  %v967_v23 = vld [vmem:[%s1400_s3] sm:$0xff]  ;;  %s1075_s13 = smov 64   ;;  %v143_v62 = vlaneseq }
   0x5   :  { %v49_v3 = vsel %vm45_vm0, %v1165_v2, 0.0  ;;  %1005 = vrcp.f32 %v1073_v4  ;;  %v968_v21 = vld [vmem:[%s1400_s3 + $0x8] sm:$0xff]  ;;  %v998_v42 = vld [vmem:[%s1398_s1] ss:$0 sm:$0xff]  ;;  %s1074_s1 = smov 88   ;;  %s1076_s14 = smov 96  }
   0x6   :  { %135 = vmatpush.bf16.msra.mxu0 %v968_v21  ;;  %v999_v47 = vld [vmem:[%s1399_s2] ss:$0 sm:$0xff]  ;;  %s1077_s2 = smov 120   ;;  %s1078_s15 = smov 104   ;;  %vm152_vm8 = vcmask 64512   ;;  %vm191_vm9 = vcmask 1043456  }
   0x7   :  { %s1079_s16 = smov 112   ;;  %v144_v63 = vshrl.u32 %v143_v62, 7  ;;  %v146_v1 = vand.u32 127, %v143_v62  ;;  %s1080_s17 = smov 80   ;;  %vm271_vm11 = vcmask 130112   ;;  %vm335_vm12 = vcmask 195712  }
   0x8   :  { %s1081_s18 = smov 72   ;;  %s1082_s19 = smov 48   ;;  %vm399_vm13 = vcmask 261312  }
   0x9   :  { %vm1213_vm10 = vcmp.le.s32.totalorder %v146_v1, %v144_v63  ;;  %s1083_s20 = smov 56   ;;  %s1084_s21 = smov 40  }
   0xa   :  { %136 = vmatpush.bf16.msra.mxu0 %v967_v23  ;;  %s1085_s22 = smov 8   ;;  %s1086_s23 = smov 16  }
   0xb   :  { %50 = vadd.xlane.f32.xlu0 %v49_v3  ;;  %v1006_v5 = vpop.eup %1005  ;;  %s1087_s24 = smov 24  }
   0xc   :  { %v53_v6 = vmul.f32 32.0, %v1006_v5  ;;  %vm57_vm1 = vweird.f32 %v1006_v5 }
   0xe   :  { %v54_v7 = vsub.f32 1.0, %v53_v6 }
  0x10   :  { %v55_v8 = vmul.f32 %v1006_v5, %v54_v7 }
  0x12   :  { %v56_v9 = vadd.f32 %v1006_v5, %v55_v8 }
  0x14   :  { %v1169_v10 = vsel %vm57_vm1, %v1006_v5, %v56_v9 }
  0x76   :  { %v48_v11 = vpop.xlane.xlu0 %47 }
  0x77   :  { %v59_v12 = vmul.f32 %v1169_v10, %v48_v11 }
  0x79   :  { %v61_v13 = vsub.f32 %v1158_v0, %v59_v12 }
  0x7b   :  { %v63_v14 = vmul.f32 %v61_v13, %v61_v13 }
  0x7d   :  { %v65_v15 = vsel %vm45_vm0, %v63_v14, 0.0 }
  0x7e   :  { %66 = vadd.xlane.f32.xlu1 %v65_v15  ;;  %v51_v16 = vpop.xlane.xlu0 %50 }
  0x7f   :  { %v60_v17 = vmul.f32 %v1169_v10, %v51_v16 }
  0x81   :  { %v62_v18 = vsub.f32 %v1165_v2, %v60_v17 }
  0x83   :  { %v64_v19 = vmul.f32 %v62_v18, %v62_v18 }
  0x85   :  { %v68_v20 = vsel %vm45_vm0, %v64_v19, 0.0 }
  0x86   :  { %69 = vadd.xlane.f32.xlu1 %v68_v20 }
  0xf1   :  { %v67_v22 = vpop.xlane.xlu1 %66 }
  0xf2   :  { %v71_v24 = vmul.f32 %v67_v22, %v1169_v10 }
  0xf4   :  { %v73_v25 = vadd.f32 1e-05, %v71_v24 }
  0xf6   :  { %1007 = vrsqrt.f32 %v73_v25  ;;  %vm81_vm3 = vweird.f32 %v73_v25 }
  0xf9   :  { %v70_v26 = vpop.xlane.xlu1 %69 }
  0xfa   :  { %v72_v27 = vmul.f32 %v70_v26, %v1169_v10 }
  0xfc   :  { %v1008_v28 = vpop.eup %1007  ;;  %v74_v29 = vadd.f32 1e-05, %v72_v27 }
  0xfd   :  { %v76_v30 = vmul.f32 %v1008_v28, %v73_v25  ;;  %vm82_vm2 = vweird.f32 %v1008_v28 }
  0xfe   :  { %1009 = vrsqrt.f32 %v74_v29  ;;  %vm83_vm4 = vmor %vm81_vm3, %vm82_vm2  ;;  %vm91_vm6 = vweird.f32 %v74_v29 }
  0xff   :  { %v77_v31 = vmul.f32 %v1008_v28, %v76_v30 }
 0x101   :  { %v78_v32 = vmul.f32 0.5, %v77_v31 }
 0x103   :  { %v79_v33 = vsub.f32 1.5, %v78_v32 }
 0x104   :  { %v1010_v34 = vpop.eup %1009 }
 0x105   :  { %v80_v35 = vmul.f32 %v1008_v28, %v79_v33  ;;  %v86_v36 = vmul.f32 %v1010_v34, %v74_v29  ;;  %vm92_vm5 = vweird.f32 %v1010_v34 }
 0x106   :  { %vm93_vm7 = vmor %vm91_vm6, %vm92_vm5 }
 0x107   :  { %v87_v37 = vmul.f32 %v1010_v34, %v86_v36  ;;  %v84_v38 = vsel %vm83_vm4, %v1008_v28, %v80_v35 }
 0x108   :  { %v95_v41 = vmul.f32 %v84_v38, %v61_v13 }
 0x109   :  { %v88_v39 = vmul.f32 0.5, %v87_v37 }
 0x10a   :  { %v101_v46 = vmul.f32 %v998_v42, %v95_v41 }
 0x10b   :  { %v89_v40 = vsub.f32 1.5, %v88_v39 }
 0x10c   :  { %v107_v49 = vadd.f32 %v999_v47, %v101_v46 }
 0x10d   :  { %v90_v43 = vmul.f32 %v1010_v34, %v89_v40 }
 0x10f   :  { %v94_v44 = vsel %vm93_vm7, %v1010_v34, %v90_v43 }
 0x110   :  { %v96_v45 = vmul.f32 %v94_v44, %v62_v18 }
 0x112   :  { %v102_v48 = vmul.f32 %v998_v42, %v96_v45 }
 0x114   :  { %v108_v50 = vadd.f32 %v999_v47, %v102_v48 }
 0x116   :  { %v109_v51 = vpack.c.bf16 %v108_v50, %v107_v49 }
 0x118   :  { %900 = vmatmul.msk.bf16.vlgmr.msra.gmra.mxu0 %vm45_vm0, %v109_v51 }
 0x195   :  { %v138_v52 = vpop.f32.mrf.mxu0 }
 0x196   :  { %v1192_v53 = vpack.c.bf16 %v138_v52, %v138_v52 }
 0x198   :  { %211 = vrot.lane.b32.xlu0 %v1192_v53, %s1074_s1  ;;  %186 = vrot.lane.b32.xlu1 %v1192_v53, %s1075_s13 }
 0x199   :  { %150 = vrot.lane.b32.xlu2 %v1192_v53, %s1076_s14 }
 0x19d   :  { %v140_v54 = vpop.f32.mrf.mxu0 }
 0x19e   :  { %v1204_v55 = vpack.c.bf16 %v140_v54, %v140_v54 }
 0x1a0   :  { %209 = vrot.lane.b32.xlu1 %v1192_v53, %s1077_s2 }
 0x1a8   :  { %337 = vrot.lane.b32.xlu1 %v1192_v53, %s1078_s15 }
 0x1b0   :  { %273 = vrot.lane.b32.xlu1 %v1192_v53, %s1079_s16 }
 0x1b8   :  { %403 = vrot.lane.b32.xlu1 %v1204_v55, %s1076_s14 }
 0x1c0   :  { %586 = vrot.lane.b32.xlu1 %v1204_v55, %s1078_s15 }
 0x1f3   :  { %v151_v56 = vpop.permute.xlu2 %150 }
 0x1f4   :  { %v157_v57 = vsel %vm152_vm8, %v151_v56, 0 }
 0x1f5   :  { %166 = vmatpush.bf16.xpose.msra.mxu1 %v157_v57 }
 0x1fc   :  { %901 = vmatmul.msk.bf16.vlgmr.msra.gmra.mxu1 %vm152_vm8, %v1192_v53 }
 0x20a   :  { %v212_v58 = vpop.permute.xlu0 %211  ;;  %v187_v59 = vpop.permute.xlu1 %186 }
 0x20b   :  { %v193_v60 = vsel %vm191_vm9, %v187_v59, 0  ;;  %v217_v61 = vsel %vm152_vm8, %v212_v58, 0 }
 0x20c   :  { %202 = vmatpush.bf16.msra.mxu2 %v193_v60 }
 0x210   :  { %226 = vmatpush.bf16.xpose.msrb.mxu2 %v217_v61 }
 0x212   :  { %v210_v9 = vpop.permute.xlu1 %209 }
 0x21a   :  { %v338_v11 = vpop.permute.xlu1 %337 }
 0x222   :  { %v274_v12 = vpop.permute.xlu1 %273 }
 0x22a   :  { %v404_v16 = vpop.permute.xlu1 %403 }
 0x22b   :  { %v409_v19 = vsel %vm152_vm8, %v404_v16, 0 }
 0x232   :  { %v587_v43 = vpop.permute.xlu1 %586 }
 0x279   :  { %v168_v3 = vpop.f32.mrf.mxu1 }
 0x27a   :  { %v172_v5 = vmul.f32 0.17677669, %v168_v3 }
 0x27c   :  { %v173_v6 = vsel %vm1213_vm10, %v172_v5, -inf }
 0x27d   :  { %v174_v7 = vsel %vm152_vm8, %v173_v6, -inf }
 0x27e   :  { %175 = vmax.xlane.f32.xlu2 %v174_v7 }
 0x281   :  { %v170_v8 = vpop.f32.mrf.mxu1 }
 0x296   :  { %275 = vrot.lane.b32.xlu2 %v1192_v53, %s1080_s17 }
 0x29e   :  { %525 = vrot.lane.b32.xlu2 %v1204_v55, %s1080_s17 }
 0x2f1   :  { %v176_v13 = vpop.xlane.xlu2 %175 }
 0x2f2   :  { %v177_v14 = vsub.f32 %v173_v6, %v176_v13 }
 0x2f4   :  { %v178_v15 = vmul.f32 1.442695, %v177_v14 }
 0x2f6   :  { %1011 = vpow2.f32 %v178_v15 }
 0x2f9   :  { %v276_v17 = vpop.permute.xlu2 %275 }
 0x2fa   :  { %v281_v18 = vsel %vm152_vm8, %v276_v17, 0 }
 0x2fb   :  { %290 = vmatpush.bf16.xpose.msrb.mxu0 %v281_v18 }
 0x2fc   :  { %v1012_v20 = vpop.eup %1011 }
 0x2fd   :  { %v180_v21 = vsel %vm152_vm8, %v1012_v20, 0.0 }
 0x2fe   :  { %181 = vadd.xlane.f32.xlu0 %v180_v21 }
 0x301   :  { %v526_v22 = vpop.permute.xlu2 %525 }
 0x302   :  { %v531_v23 = vsel %vm152_vm8, %v526_v22, 0  ;;  %905 = vmatmul.msk.bf16.vlgmr.msrb.gmra.mxu0 %vm152_vm8, %v274_v12 }
 0x303   :  { %418 = vmatpush.bf16.xpose.msra.mxu0 %v409_v19 }
 0x30b   :  { %540 = vmatpush.bf16.xpose.msrb.mxu0 %v531_v23 }
 0x312   :  { %339 = vrot.lane.b32.xlu0 %v1192_v53, %s1081_s18  ;;  %909 = vmatmul.msk.bf16.vlgmr.msra.gmra.mxu0 %vm152_vm8, %v1204_v55 }
 0x31a   :  { %462 = vrot.lane.b32.xlu0 %v1204_v55, %s1074_s1  ;;  %s880_s1 = sshll.u32 %s1409_s12, 4  ;;  %s881_s1 = int_to_ptr.hbm [resolvable:$true] %s880_s1 }
 0x322   :  { %460 = vrot.lane.b32.xlu0 %v1204_v55, %s1077_s2 }
 0x32a   :  { %588 = vrot.lane.b32.xlu0 %v1204_v55, %s1081_s18 }
 0x332   :  { %523 = vrot.lane.b32.xlu0 %v1204_v55, %s1079_s16 }
 0x371   :  { %v182_v24 = vpop.xlane.xlu0 %181 }
 0x372   :  { %1013 = vrcp.f32 %v182_v24 }
 0x378   :  { %v1014_v25 = vpop.eup %1013 }
 0x379   :  { %v184_v26 = vmul.f32 %v1014_v25, %v1012_v20 }
 0x37b   :  { %v185_v27 = vpack.c.bf16 %v184_v26, %v184_v26 }
 0x37d   :  { %902 = vmatmul.msk.bf16.vlgmr.msra.gmra.mxu2 %vm152_vm8, %v185_v27 }
 0x37f   :  { %v292_v28 = vpop.f32.mrf.mxu0 }
 0x380   :  { %v296_v29 = vmul.f32 0.17677669, %v292_v28 }
 0x382   :  { %v297_v30 = vsel %vm1213_vm10, %v296_v29, -inf }
 0x383   :  { %v298_v31 = vsel %vm152_vm8, %v297_v30, -inf }
 0x384   :  { %v340_v32 = vpop.permute.xlu0 %339  ;;  %299 = vmax.xlane.f32.xlu0 %v298_v31 }
 0x385   :  { %v345_v33 = vsel %vm152_vm8, %v340_v32, 0 }
 0x386   :  { %354 = vmatpush.bf16.xpose.msra.mxu3 %v345_v33 }
 0x387   :  { %v294_v34 = vpop.f32.mrf.mxu0 }
 0x38c   :  { %v463_v35 = vpop.permute.xlu0 %462 }
 0x38d   :  { %903 = vmatmul.msk.bf16.vlgmr.msrb.gmra.mxu2 %vm152_vm8, %v210_v9  ;;  %907 = vmatmul.msk.bf16.vlgmr.msra.gmra.mxu3 %vm152_vm8, %v338_v11  ;;  %v468_v36 = vsel %vm152_vm8, %v463_v35, 0 }
 0x38e   :  { %477 = vmatpush.bf16.xpose.msrb.mxu3 %v468_v36 }
 0x38f   :  { %v420_v37 = vpop.f32.mrf.mxu0 }
 0x390   :  { %v424_v56 = vmul.f32 0.17677669, %v420_v37 }
 0x392   :  { %v1258_v59 = vsel %vm1213_vm10, %v424_v56, -inf }
 0x393   :  { %v426_v61 = vsel %vm152_vm8, %v1258_v59, -inf }
 0x394   :  { %v461_v38 = vpop.permute.xlu0 %460 }
 0x397   :  { %v422_v39 = vpop.f32.mrf.mxu0 }
 0x39c   :  { %v589_v40 = vpop.permute.xlu0 %588 }
 0x39d   :  { %v594_v41 = vsel %vm152_vm8, %v589_v40, 0  ;;  %911 = vmatmul.msk.bf16.vlgmr.msrb.gmra.mxu3 %vm152_vm8, %v461_v38 }
 0x39e   :  { %603 = vmatpush.bf16.xpose.msra.mxu3 %v594_v41 }
 0x3a4   :  { %v524_v42 = vpop.permute.xlu0 %523 }
 0x3a5   :  { %913 = vmatmul.msk.bf16.vlgmr.msrb.gmra.mxu0 %vm152_vm8, %v524_v42 }
 0x3ad   :  { %915 = vmatmul.msk.bf16.vlgmr.msra.gmra.mxu3 %vm152_vm8, %v587_v43 }
 0x3f7   :  { %v300_v60 = vpop.xlane.xlu0 %299 }
 0x3f8   :  { %v301_v62 = vsub.f32 %v297_v30, %v300_v60 }
 0x3fa   :  { %v302_v1 = vmul.f32 1.442695, %v301_v62 }
 0x3fc   :  { %1015 = vpow2.f32 %v302_v1 }
 0x400   :  { %v204_v44 = vpop.f32.mrf.mxu2 }
 0x401   :  { %208 = vst.msk [vmem:[#allocation2] sm:$0xff] %vm152_vm8, %v204_v44 }
 0x402   :  { %v1016_v14 = vpop.eup %1015 }
 0x403   :  { %v304_v15 = vsel %vm152_vm8, %v1016_v14, 0.0 }
 0x408   :  { %v206_v45 = vpop.f32.mrf.mxu2 }
 0x410   :  { %v228_v46 = vpop.f32.mrf.mxu2  ;;  %v356_v47 = vpop.f32.mrf.mxu3 }
 0x411   :  { %v232_v48 = vmul.f32 0.17677669, %v228_v46  ;;  %v360_v49 = vmul.f32 0.17677669, %v356_v47 }
 0x413   :  { %v361_v50 = vsel %vm1213_vm10, %v360_v49, -inf  ;;  %v233_v51 = vsel %vm1213_vm10, %v232_v48, -inf }
 0x414   :  { %v362_v52 = vsel %vm152_vm8, %v361_v50, -inf  ;;  %v234_v54 = vsel %vm152_vm8, %v233_v51, -inf }
 0x415   :  { %363 = vmax.xlane.f32.xlu2 %v362_v52  ;;  %235 = vmax.xlane.f32.xlu1 %v234_v54 }
 0x418   :  { %v230_v57 = vpop.f32.mrf.mxu2  ;;  %v358_v58 = vpop.f32.mrf.mxu3 }
 0x41d   :  { %427 = vmax.xlane.f32.xlu1 %v426_v61 }
 0x420   :  { %v479_v63 = vpop.f32.mrf.mxu3 }
 0x421   :  { %v483_v3 = vmul.f32 0.17677669, %v479_v63 }
 0x422   :  { %v542_v5 = vpop.f32.mrf.mxu0 }
 0x423   :  { %v546_v6 = vmul.f32 0.17677669, %v542_v5  ;;  %v484_v7 = vsel %vm1213_vm10, %v483_v3, -inf }
 0x424   :  { %v485_v8 = vsel %vm152_vm8, %v484_v7, -inf }
 0x425   :  { %486 = vmax.xlane.f32.xlu2 %v485_v8  ;;  %v547_v9 = vsel %vm1213_vm10, %v546_v6, -inf }
 0x426   :  { %v548_v11 = vsel %vm152_vm8, %v547_v9, -inf }
 0x427   :  { %549 = vmax.xlane.f32.xlu1 %v548_v11 }
 0x428   :  { %v481_v12 = vpop.f32.mrf.mxu3 }
 0x42a   :  { %v544_v13 = vpop.f32.mrf.mxu0 }
 0x42f   :  { %305 = vadd.xlane.f32.xlu1 %v304_v15 }
 0x430   :  { %v605_v16 = vpop.f32.mrf.mxu3 }
 0x431   :  { %v609_v17 = vmul.f32 0.17677669, %v605_v16 }
 0x433   :  { %v610_v18 = vsel %vm1213_vm10, %v609_v17, -inf }
 0x434   :  { %v611_v19 = vsel %vm152_vm8, %v610_v18, -inf }
 0x435   :  { %612 = vmax.xlane.f32.xlu0 %v611_v19 }
 0x438   :  { %v607_v20 = vpop.f32.mrf.mxu3 }
 0x448   :  { %310 = vrot.lane.b32.xlu1 %v1192_v53, %s1082_s19 }
 0x449   :  { %246 = vrot.lane.b32.xlu0 %v1192_v53, %s1083_s20 }
 0x450   :  { %497 = vrot.lane.b32.xlu1 %v1204_v55, %s1083_s20 }
 0x458   :  { %438 = vrot.lane.b32.xlu1 %v1204_v55, %s1075_s13 }
 0x488   :  { %v364_v21 = vpop.xlane.xlu2 %363  ;;  %v236_v22 = vpop.xlane.xlu1 %235 }
 0x489   :  { %v365_v4 = vsub.f32 %v361_v50, %v364_v21  ;;  %v237_v24 = vsub.f32 %v233_v51, %v236_v22 }
 0x48b   :  { %v366_v23 = vmul.f32 1.442695, %v365_v4  ;;  %v238_v25 = vmul.f32 1.442695, %v237_v24 }
 0x48d   :  { %1017 = vpow2.f32 %v366_v23 }
 0x48e   :  { %1019 = vpow2.f32 %v238_v25 }
 0x490   :  { %v428_v26 = vpop.xlane.xlu1 %427 }
 0x491   :  { %v429_v58 = vsub.f32 %v1258_v59, %v428_v26 }
 0x493   :  { %v1278_v27 = vpop.eup %1017  ;;  %v430_v60 = vmul.f32 1.442695, %v429_v58 }
 0x494   :  { %v368_v28 = vsel %vm152_vm8, %v1278_v27, 0.0  ;;  %v1020_v30 = vpop.eup %1019 }
 0x495   :  { %369 = vadd.xlane.f32.xlu2 %v368_v28  ;;  %v240_v35 = vsel %vm152_vm8, %v1020_v30, 0.0 }
 0x498   :  { %v487_v29 = vpop.xlane.xlu2 %486 }
 0x499   :  { %v488_v31 = vsub.f32 %v484_v7, %v487_v29 }
 0x49a   :  { %v550_v32 = vpop.xlane.xlu1 %549 }
 0x49b   :  { %v489_v33 = vmul.f32 1.442695, %v488_v31  ;;  %v551_v34 = vsub.f32 %v547_v9, %v550_v32 }
 0x49d   :  { %1021 = vpow2.f32 %v489_v33  ;;  %241 = vadd.xlane.f32.xlu2 %v240_v35  ;;  %v552_v36 = vmul.f32 1.442695, %v551_v34 }
 0x49f   :  { %1023 = vpow2.f32 %v552_v36 }
 0x4a2   :  { %v306_v44 = vpop.xlane.xlu1 %305 }
 0x4a3   :  { %v1283_v37 = vpop.eup %1021 }
 0x4a4   :  { %v491_v38 = vsel %vm152_vm8, %v1283_v37, 0.0 }
 0x4a5   :  { %492 = vadd.xlane.f32.xlu0 %v491_v38  ;;  %v1287_v40 = vpop.eup %1023 }
 0x4a6   :  { %v554_v43 = vsel %vm152_vm8, %v1287_v40, 0.0 }
 0x4a8   :  { %v613_v39 = vpop.xlane.xlu0 %612 }
 0x4a9   :  { %v614_v41 = vsub.f32 %v610_v18, %v613_v39 }
 0x4ab   :  { %v615_v42 = vmul.f32 1.442695, %v614_v41 }
 0x4ad   :  { %1025 = vpow2.f32 %v615_v42  ;;  %555 = vadd.xlane.f32.xlu0 %v554_v43 }
 0x4ae   :  { %1027 = vrcp.f32 %v306_v44 }
 0x4af   :  { %1029 = vpow2.f32 %v430_v60 }
 0x4b3   :  { %v1026_v45 = vpop.eup %1025 }
 0x4b4   :  { %v617_v46 = vsel %vm152_vm8, %v1026_v45, 0.0  ;;  %v1028_v47 = vpop.eup %1027 }
 0x4b5   :  { %374 = vrot.lane.b32.xlu2 %v1192_v53, %s1084_s21  ;;  %618 = vadd.xlane.f32.xlu1 %v617_v46  ;;  %v308_v48 = vmul.f32 %v1028_v47, %v1016_v14  ;;  %v1030_v61 = vpop.eup %1029 }
 0x4b6   :  { %v432_v62 = vsel %vm152_vm8, %v1030_v61, 0.0 }
 0x4b7   :  { %v309_v54 = vpack.c.bf16 %v308_v48, %v308_v48  ;;  %v970_v48 = vld [vmem:[%s1401_s4 + $0x8] sm:$0xff] }
 0x4b8   :  { %681 = vmatpush.bf16.msra.mxu0 %v970_v48  ;;  %v974_v48 = vld [vmem:[%s1407_s10 + $0x8] sm:$0xff] }
 0x4ba   :  { %v311_v49 = vpop.permute.xlu1 %310 }
 0x4bb   :  { %v247_v50 = vpop.permute.xlu0 %246  ;;  %v316_v51 = vsel %vm191_vm9, %v311_v49, 0  ;;  %v969_v49 = vld [vmem:[%s1401_s4] sm:$0xff] }
 0x4bc   :  { %v252_v52 = vsel %vm191_vm9, %v247_v50, 0  ;;  %325 = vmatpush.bf16.msrb.mxu1 %v316_v51  ;;  %682 = vmatpush.bf16.msra.mxu0 %v969_v49  ;;  %v973_v49 = vld [vmem:[%s1407_s10] sm:$0xff] }
 0x4bd   :  { %261 = vmatpush.bf16.msra.mxu2 %v252_v52 }
 0x4bf   :  { %906 = vmatmul.msk.bf16.vlgmr.msrb.gmra.mxu1 %vm152_vm8, %v309_v54 }
 0x4c1   :  { %623 = vrot.lane.b32.xlu0 %v1204_v55, %s1084_s21 }
 0x4c2   :  { %v498_v56 = vpop.permute.xlu1 %497 }
 0x4c3   :  { %v503_v59 = vsel %vm191_vm9, %v498_v56, 0 }
 0x4ca   :  { %v439_v57 = vpop.permute.xlu1 %438 }
 0x4cb   :  { %v444_v53 = vsel %vm191_vm9, %v439_v57, 0 }
 0x4cc   :  { %453 = vmatpush.bf16.msra.mxu1 %v444_v53  ;;  %v1000_v53 = vld [vmem:[%s1402_s5] ss:$0 sm:$0xff] }
 0x4de   :  { %433 = vadd.xlane.f32.xlu2 %v432_v62 }
 0x4f6   :  { %560 = vrot.lane.b32.xlu2 %v1204_v55, %s1082_s19 }
 0x508   :  { %v370_v63 = vpop.xlane.xlu2 %369 }
 0x510   :  { %v242_v1 = vpop.xlane.xlu2 %241 }
 0x511   :  { %1031 = vrcp.f32 %v242_v1 }
 0x512   :  { %1033 = vrcp.f32 %v370_v63 }
 0x517   :  { %v1032_v3 = vpop.eup %1031 }
 0x518   :  { %v244_v5 = vmul.f32 %v1032_v3, %v1020_v30  ;;  %v375_v6 = vpop.permute.xlu2 %374  ;;  %v493_v9 = vpop.xlane.xlu0 %492 }
 0x519   :  { %v380_v7 = vsel %vm191_vm9, %v375_v6, 0  ;;  %v1034_v11 = vpop.eup %1033  ;;  %1035 = vrcp.f32 %v493_v9 }
 0x51a   :  { %v245_v8 = vpack.c.bf16 %v244_v5, %v244_v5  ;;  %389 = vmatpush.bf16.msrb.mxu2 %v380_v7  ;;  %v372_v55 = vmul.f32 %v1034_v11, %v1278_v27 }
 0x51c   :  { %904 = vmatmul.msk.bf16.vlgmr.msra.gmra.mxu2 %vm152_vm8, %v245_v8  ;;  %v373_v12 = vpack.c.bf16 %v372_v55, %v372_v55 }
 0x51e   :  { %512 = vmatpush.bf16.msra.mxu2 %v503_v59 }
 0x51f   :  { %v1036_v14 = vpop.eup %1035 }
 0x520   :  { %v556_v13 = vpop.xlane.xlu0 %555  ;;  %v495_v17 = vmul.f32 %v1036_v14, %v1283_v37 }
 0x522   :  { %v496_v18 = vpack.c.bf16 %v495_v17, %v495_v17  ;;  %v971_v17 = vld [vmem:[%s1405_s8] sm:$0xff] }
 0x528   :  { %v619_v19 = vpop.xlane.xlu1 %618 }
 0x529   :  { %1037 = vrcp.f32 %v619_v19 }
 0x52c   :  { %908 = vmatmul.msk.bf16.vlgmr.msrb.gmra.mxu2 %vm152_vm8, %v373_v12 }
 0x52f   :  { %v1038_v21 = vpop.eup %1037 }
 0x530   :  { %v621_v4 = vmul.f32 %v1038_v21, %v1026_v45  ;;  %v979_v21 = vld [vmem:[%s1407_s10 + $0x30] sm:$0xff] }
 0x532   :  { %v622_v23 = vpack.c.bf16 %v621_v4, %v621_v4 }
 0x533   :  { %v624_v15 = vpop.permute.xlu0 %623 }
 0x534   :  { %v629_v16 = vsel %vm191_vm9, %v624_v15, 0 }
 0x535   :  { %638 = vmatpush.bf16.msrb.mxu2 %v629_v16 }
 0x53c   :  { %v327_v20 = vpop.f32.mrf.mxu1  ;;  %912 = vmatmul.msk.bf16.vlgmr.msra.gmra.mxu2 %vm152_vm8, %v496_v18  ;;  %v980_v18 = vld [vmem:[%s1407_s10 + $0x38] sm:$0xff] }
 0x53d   :  { %856 = vmatpush.bf16.msrb.mxu3 %v980_v18 }
 0x541   :  { %857 = vmatpush.bf16.msrb.mxu3 %v979_v21 }
 0x544   :  { %v329_v22 = vpop.f32.mrf.mxu1 }
 0x54c   :  { %916 = vmatmul.msk.bf16.vlgmr.msrb.gmra.mxu2 %vm152_vm8, %v622_v23 }
 0x551   :  { %v434_v24 = vpop.xlane.xlu2 %433 }
 0x552   :  { %1039 = vrcp.f32 %v434_v24  ;;  %v978_v24 = vld [vmem:[%s1407_s10 + $0x28] sm:$0xff] }
 0x553   :  { %1041 = vrcp.f32 %v556_v13  ;;  %v972_v13 = vld [vmem:[%s1405_s8 + $0x8] sm:$0xff]  ;;  %858 = vmatpush.bf16.msrb.mxu3 %v978_v24 }
 0x558   :  { %v1040_v25 = vpop.eup %1039 }
 0x559   :  { %v436_v26 = vmul.f32 %v1040_v25, %v1030_v61  ;;  %v561_v27 = vpop.permute.xlu2 %560  ;;  %v1042_v30 = vpop.eup %1041 }
 0x55a   :  { %v566_v28 = vsel %vm191_vm9, %v561_v27, 0  ;;  %v558_v31 = vmul.f32 %v1042_v30, %v1287_v40 }
 0x55b   :  { %v437_v29 = vpack.c.bf16 %v436_v26, %v436_v26  ;;  %575 = vmatpush.bf16.msrb.mxu1 %v566_v28 }
 0x55c   :  { %v559_v32 = vpack.c.bf16 %v558_v31, %v558_v31 }
 0x55d   :  { %910 = vmatmul.msk.bf16.vlgmr.msra.gmra.mxu1 %vm152_vm8, %v437_v29 }
 0x55f   :  { %777 = vmatpush.bf16.msra.mxu1 %v972_v13 }
 0x563   :  { %778 = vmatpush.bf16.msra.mxu1 %v971_v17 }
 0x56d   :  { %914 = vmatmul.msk.bf16.vlgmr.msrb.gmra.mxu1 %vm152_vm8, %v559_v32 }
 0x59f   :  { %v263_v33 = vpop.f32.mrf.mxu2 }
 0x5a0   :  { %268 = vrot.lane.b32.xlu0 %v263_v33, %s1085_s22 }
 0x5a7   :  { %v265_v34 = vpop.f32.mrf.mxu2 }
 0x5a8   :  { %332 = vrot.lane.b32.xlu0 %v327_v20, %s1086_s23 }
 0x5af   :  { %v391_v35 = vpop.f32.mrf.mxu2 }
 0x5b0   :  { %396 = vrot.lane.b32.xlu0 %v391_v35, %s1087_s24  ;;  %v1001_v35 = vld [vmem:[%s1403_s6] ss:$0 sm:$0xff] }
 0x5b7   :  { %v393_v36 = vpop.f32.mrf.mxu2 }
 0x5bf   :  { %v514_v37 = vpop.f32.mrf.mxu2 }
 0x5c0   :  { %519 = vrot.lane.b32.xlu1 %v514_v37, %s1085_s22 }
 0x5c7   :  { %v516_v38 = vpop.f32.mrf.mxu2 }
 0x5cf   :  { %v640_v39 = vpop.f32.mrf.mxu2 }
 0x5d7   :  { %v642_v40 = vpop.f32.mrf.mxu2 }
 0x5da   :  { %v455_v41 = vpop.f32.mrf.mxu1 }
 0x5db   :  { %459 = vst.msk [vmem:[#allocation2 + $0x8] sm:$0xff] %vm152_vm8, %v455_v41 }
 0x5e2   :  { %v457_v42 = vpop.f32.mrf.mxu1 }
 0x5ea   :  { %v577_v43 = vpop.f32.mrf.mxu1 }
 0x5eb   :  { %582 = vrot.lane.b32.xlu2 %v577_v43, %s1086_s23 }
 0x5f2   :  { %v579_v44 = vpop.f32.mrf.mxu1 }
 0x5f3   :  { %645 = vrot.lane.b32.xlu2 %v640_v39, %s1087_s24  ;;  %v1002_v39 = vld [vmem:[%s1404_s7] ss:$0 sm:$0xff] }
 0x612   :  { %v269_v45 = vpop.permute.xlu0 %268 }
 0x613   :  { %272 = vst.msk [vmem:[#allocation2] sm:$0xff] %vm271_vm11, %v269_v45 }
 0x61a   :  { %v333_v46 = vpop.permute.xlu0 %332 }
 0x61b   :  { %336 = vst.msk [vmem:[#allocation2] sm:$0xff] %vm335_vm12, %v333_v46  ;;  %v976_v46 = vld [vmem:[%s1407_s10 + $0x18] sm:$0xff] }
 0x622   :  { %v397_v47 = vpop.permute.xlu0 %396 }
 0x623   :  { %400 = vst.msk [vmem:[#allocation2] sm:$0xff] %vm399_vm13, %v397_v47  ;;  %v975_v47 = vld [vmem:[%s1407_s10 + $0x10] sm:$0xff] }
 0x62a   :  { %v649_v54 = vld [vmem:[#allocation2] sm:$0xff] }
 0x632   :  { %v520_v50 = vpop.permute.xlu1 %519 }
 0x633   :  { %522 = vst.msk [vmem:[#allocation2 + $0x8] sm:$0xff] %vm271_vm11, %v520_v50 }
 0x645   :  { %v583_v51 = vpop.permute.xlu2 %582 }
 0x646   :  { %585 = vst.msk [vmem:[#allocation2 + $0x8] sm:$0xff] %vm335_vm12, %v583_v51  ;;  %v1003_v51 = vld [vmem:[%s1406_s9] ss:$0 sm:$0xff] }
 0x64d   :  { %v646_v52 = vpop.permute.xlu2 %645 }
 0x64e   :  { %648 = vst.msk [vmem:[#allocation2 + $0x8] sm:$0xff] %vm399_vm13, %v646_v52 }
 0x655   :  { %v650_v56 = vld [vmem:[#allocation2 + $0x8] sm:$0xff] }
 0x656   :  { %v651_v57 = vpack.c.bf16 %v650_v56, %v649_v54 }
 0x658   :  { %925 = vmatmul.msk.bf16.vlgmr.msra.gmra.mxu0 %vm45_vm0, %v651_v57 }
 0x6d5   :  { %v684_v58 = vpop.f32.mrf.mxu0 }
 0x6d6   :  { %v685_v60 = vadd.f32 %v1000_v53, %v684_v58 }
 0x6d8   :  { %v1329_v61 = vadd.f32 %v685_v60, %v1158_v0  ;;  %v1004_v60 = vld [vmem:[%s1408_s11] ss:$0 sm:$0xff]  ;;  %s1089_s11 = smov 128  }
 0x6da   :  { %v691_v62 = vsel %vm45_vm0, %v1329_v61, 0.0 }
 0x6db   :  { %692 = vadd.xlane.f32.xlu0 %v691_v62 }
 0x6dd   :  { %v686_v63 = vpop.f32.mrf.mxu0 }
 0x6de   :  { %v687_v1 = vadd.f32 %v1000_v53, %v686_v63 }
 0x6e0   :  { %v1334_v3 = vadd.f32 %v687_v1, %v1165_v2 }
 0x6e2   :  { %v694_v5 = vsel %vm45_vm0, %v1334_v3, 0.0 }
 0x6e3   :  { %695 = vadd.xlane.f32.xlu2 %v694_v5 }
 0x74e   :  { %v693_v6 = vpop.xlane.xlu0 %692 }
 0x74f   :  { %v697_v7 = vmul.f32 %v693_v6, %v1169_v10 }
 0x751   :  { %v699_v8 = vsub.f32 %v1329_v61, %v697_v7 }
 0x753   :  { %v701_v0 = vmul.f32 %v699_v8, %v699_v8 }
 0x755   :  { %v703_v59 = vsel %vm45_vm0, %v701_v0, 0.0 }
 0x756   :  { %v696_v9 = vpop.xlane.xlu2 %695  ;;  %704 = vadd.xlane.f32.xlu1 %v703_v59 }
 0x757   :  { %v698_v11 = vmul.f32 %v696_v9, %v1169_v10 }
 0x759   :  { %v700_v55 = vsub.f32 %v1334_v3, %v698_v11 }
 0x75b   :  { %v702_v2 = vmul.f32 %v700_v55, %v700_v55 }
 0x75d   :  { %v706_v12 = vsel %vm45_vm0, %v702_v2, 0.0 }
 0x75e   :  { %707 = vadd.xlane.f32.xlu0 %v706_v12 }
 0x7c9   :  { %v705_v14 = vpop.xlane.xlu1 %704 }
 0x7ca   :  { %v709_v15 = vmul.f32 %v705_v14, %v1169_v10 }
 0x7cc   :  { %v711_v16 = vadd.f32 1e-05, %v709_v15 }
 0x7ce   :  { %1043 = vrsqrt.f32 %v711_v16  ;;  %vm719_vm15 = vweird.f32 %v711_v16 }
 0x7d1   :  { %v708_v19 = vpop.xlane.xlu0 %707 }
 0x7d2   :  { %v710_v20 = vmul.f32 %v708_v19, %v1169_v10  ;;  %v977_v10 = vld [vmem:[%s1407_s10 + $0x20] sm:$0xff]  ;;  %s1088_s10 = smov [#allocation3]  }
 0x7d3   :  { %859 = vmatpush.bf16.msrb.mxu3 %v977_v10  ;;  %s878_s29 = sshll.u32 %s1088_s10, 4  ;;  %s879_s29 = int_to_ptr.vmem [resolvable:$true] %s878_s29 }
 0x7d4   :  { %v1044_v22 = vpop.eup %1043  ;;  %v712_v4 = vadd.f32 1e-05, %v710_v20 }
 0x7d5   :  { %v714_v23 = vmul.f32 %v1044_v22, %v711_v16  ;;  %vm720_vm14 = vweird.f32 %v1044_v22 }
 0x7d6   :  { %1045 = vrsqrt.f32 %v712_v4  ;;  %vm721_vm1 = vmor %vm719_vm15, %vm720_vm14  ;;  %vm729_vm3 = vweird.f32 %v712_v4 }
 0x7d7   :  { %v715_v25 = vmul.f32 %v1044_v22, %v714_v23  ;;  %860 = vmatpush.bf16.msrb.mxu3 %v976_v46 }
 0x7d9   :  { %v716_v26 = vmul.f32 0.5, %v715_v25 }
 0x7db   :  { %v717_v27 = vsub.f32 1.5, %v716_v26  ;;  %861 = vmatpush.bf16.msrb.mxu3 %v975_v47 }
 0x7dc   :  { %v1046_v28 = vpop.eup %1045 }
 0x7dd   :  { %v718_v29 = vmul.f32 %v1044_v22, %v717_v27  ;;  %v724_v30 = vmul.f32 %v1046_v28, %v712_v4  ;;  %vm730_vm2 = vweird.f32 %v1046_v28 }
 0x7de   :  { %vm731_vm4 = vmor %vm729_vm3, %vm730_vm2 }
 0x7df   :  { %v725_v31 = vmul.f32 %v1046_v28, %v724_v30  ;;  %v722_v32 = vsel %vm721_vm1, %v1044_v22, %v718_v29  ;;  %862 = vmatpush.bf16.msrb.mxu3 %v974_v48 }
 0x7e0   :  { %v733_v36 = vmul.f32 %v722_v32, %v699_v8 }
 0x7e1   :  { %v726_v33 = vmul.f32 0.5, %v725_v31 }
 0x7e2   :  { %v739_v40 = vmul.f32 %v1001_v35, %v733_v36 }
 0x7e3   :  { %v727_v34 = vsub.f32 1.5, %v726_v33  ;;  %863 = vmatpush.bf16.msrb.mxu3 %v973_v49 }
 0x7e4   :  { %v745_v43 = vadd.f32 %v1002_v39, %v739_v40 }
 0x7e5   :  { %v728_v37 = vmul.f32 %v1046_v28, %v727_v34 }
 0x7e7   :  { %v732_v38 = vsel %vm731_vm4, %v1046_v28, %v728_v37 }
 0x7e8   :  { %v734_v41 = vmul.f32 %v732_v38, %v700_v55 }
 0x7ea   :  { %v740_v42 = vmul.f32 %v1001_v35, %v734_v41 }
 0x7ec   :  { %v746_v44 = vadd.f32 %v1002_v39, %v740_v42 }
 0x7ee   :  { %v747_v45 = vpack.c.bf16 %v746_v44, %v745_v43 }
 0x7f0   :  { %934 = vmatmul.msk.bf16.vlgmr.msra.gmra.mxu1 %vm45_vm0, %v747_v45 }
 0x86d   :  { %v780_v50 = vpop.f32.mrf.mxu1 }
 0x86e   :  { %v781_v52 = vadd.f32 %v1003_v51, %v780_v50 }
 0x870   :  { %v785_v57 = vmax.f32 %v781_v52, 0.0 }
 0x875   :  { %v782_v54 = vpop.f32.mrf.mxu1 }
 0x876   :  { %v783_v56 = vadd.f32 %v1003_v51, %v782_v54 }
 0x878   :  { %v786_v53 = vmax.f32 %v783_v56, 0.0 }
 0x87a   :  { %v787_v58 = vpack.c.bf16 %v786_v53, %v785_v57 }
 0x87c   :  { %864 = vmatmul.bf16.vlgmr.msrb.gmra.mxu3 %v787_v58 }
 0x8ff   :  { %v865_v62 = vpop.f32.mrf.mxu3 }
 0x900   :  { %v866_v63 = vadd.f32 %v1004_v60, %v865_v62 }
 0x902   :  { %v870_v1 = vadd.f32 %v866_v63, %v1329_v61 }
 0x904   :  { %872 = vst.msk [vmem:[#allocation3] sm:$0xff] %vm45_vm0, %v870_v1 }
 0x907   :  { %v867_v5 = vpop.f32.mrf.mxu3 }
 0x908   :  { %v868_v6 = vadd.f32 %v1004_v60, %v867_v5 }
 0x90a   :  { %v871_v7 = vadd.f32 %v868_v6, %v1334_v3 }
 0x90c   :  { %873 = vst.msk [vmem:[#allocation3 + $0x8] sm:$0xff] %vm45_vm0, %v871_v7 }
 0x90d   :  { %886 = dma.vmem_to_hbm [thread:$0]  %s879_s29, 256, %s881_s1, [#allocation4], %s1089_s11, %s1089_s11, %s1085_s22  }
 0x90e   :  { %1071 = dma.done.wait [#allocation4], 256  }
 0x90f   :  { %1072 = vsyncadd [#allocation4], 4294967040 }
 0x910   :  { %891 = vsyncpa [#allocation4], 1 }

</bundles_post_ra>
